<compile_context>
chip_gen: v6e
topology: v6e:2x2x1
jax: 0.10.0
libtpu: 0.0.40
codegen_flags: <defaults>
</compile_context>

<pallas_src>
import functools
import math

import jax
import jax.numpy as jnp
from jax.experimental import pallas as pl
from jax.experimental.pallas import tpu as pltpu


def msef_kernel(x_ref, cp_ref, sew_ref, seb1_ref, o_ref, pad_ref,
                *, H, W, C, Cr, eps):
    # x_ref block: (1, H, W, C) float32 (NHWC, channels on lanes).
    x = x_ref[0]                                   # (H, W, C)

    gamma = cp_ref[0:1, :]                         # (1, C)
    beta = cp_ref[1:2, :]                          # (1, C)
    dw_b = cp_ref[2:3, :]                          # (1, C)
    se_b2 = cp_ref[3:4, :]                         # (1, C)

    # ---- LayerNorm over channels (per pixel), biased variance like nn.LayerNorm ----
    mean = jnp.mean(x, axis=-1, keepdims=True)     # (H, W, 1)
    xc = x - mean
    var = jnp.mean(xc * xc, axis=-1, keepdims=True)
    x_norm = xc * jax.lax.rsqrt(var + eps) * gamma + beta        # (H, W, C)

    # ---- SE branch: global average pool + two tiny FCs (VPU broadcast-reduce) ----
    pooled = jnp.mean(jnp.mean(x_norm, axis=0), axis=0, keepdims=True)   # (1, C)
    w1 = sew_ref[0:Cr, :]                          # (Cr, C)  = fc1.weight
    w2t = sew_ref[Cr:2 * Cr, :]                    # (Cr, C)  = fc2.weight.T
    h = jnp.maximum(
        jnp.sum(w1 * pooled, axis=1, keepdims=True) + seb1_ref[...], 0.0)  # (Cr, 1)
    se = jnp.tanh(jnp.sum(w2t * h, axis=0, keepdims=True) + se_b2)         # (1, C)

    # ---- Depthwise 3x3 conv (padding=1) on x_norm via a zero-padded VMEM scratch ----
    pad_ref[...] = jnp.zeros_like(pad_ref)
    pad_ref[1:H + 1, 1:W + 1, :] = x_norm
    x1 = jnp.zeros((H, W, C), jnp.float32) + dw_b                 # bias init
    for t in range(9):                                            # static -> unrolled
        dy, dx = t // 3, t % 3
        x1 = x1 + pad_ref[dy:dy + H, dx:dx + W, :] * cp_ref[4 + t:5 + t, :]

    # ---- Fuse: depthwise(x_norm) * (x_norm * se) + residual ----
    o_ref[0] = (x1 * (x_norm * se) + x).astype(o_ref.dtype)


def msef_forward(x_nchw, params, eps=1e-5):
    B, C, H, W = x_nchw.shape
    Cr = params["w1"].shape[0]

    # Layout plumbing in the wrapper: NCHW -> NHWC so channels sit on lanes.
    x_nhwc = jnp.transpose(x_nchw, (0, 2, 3, 1)).astype(jnp.float32)     # (B, H, W, C)

    # Pack all per-channel params into one (13, C) array (single small DMA):
    #  row 0: LN gamma, 1: LN beta, 2: dw conv bias, 3: SE fc2 bias,
    #  rows 4..12: depthwise taps, row 4 + 3*i + j holds weight[:, 0, i, j].
    chan_params = jnp.concatenate([
        params["gamma"].reshape(1, C).astype(jnp.float32),
        params["beta"].reshape(1, C).astype(jnp.float32),
        params["dw_b"].reshape(1, C).astype(jnp.float32),
        params["b2"].reshape(1, C).astype(jnp.float32),
        params["dw_w"].reshape(C, 9).T.astype(jnp.float32),
    ], axis=0)                                                            # (13, C)

    se_w = jnp.concatenate(
        [params["w1"], params["w2"].T], axis=0).astype(jnp.float32)       # (2*Cr, C)
    se_b1 = params["b1"].reshape(Cr, 1).astype(jnp.float32)               # (Cr, 1)

    kernel = functools.partial(msef_kernel, H=H, W=W, C=C, Cr=Cr, eps=eps)

    out_nhwc = pl.pallas_call(
        kernel,
        out_shape=jax.ShapeDtypeStruct((B, H, W, C), jnp.float32),
        grid_spec=pltpu.PrefetchScalarGridSpec(
            num_scalar_prefetch=0,
            grid=(B,),
            in_specs=[
                pl.BlockSpec((1, H, W, C), lambda b: (b, 0, 0, 0)),   # x (NHWC)
                pl.BlockSpec((13, C), lambda b: (0, 0)),              # packed per-channel params
                pl.BlockSpec((2 * Cr, C), lambda b: (0, 0)),          # SE fc weights
                pl.BlockSpec((Cr, 1), lambda b: (0, 0)),              # SE fc1 bias
            ],
            out_specs=pl.BlockSpec((1, H, W, C), lambda b: (b, 0, 0, 0)),
            scratch_shapes=[pltpu.VMEM((H + 2, W + 2, C), jnp.float32)],
        ),
        compiler_params=pltpu.CompilerParams(dimension_semantics=("parallel",)),
    )(x_nhwc, chan_params, se_w, se_b1)

    return jnp.transpose(out_nhwc, (0, 3, 1, 2))                          # back to NCHW


def msef_reference(x, params, eps=1e-5):
    """Pure-JAX reference mirroring the PyTorch MSEFBlock forward exactly."""
    B, C, H, W = x.shape
    xt = jnp.transpose(x, (0, 2, 3, 1))                                   # NHWC
    mean = xt.mean(-1, keepdims=True)
    var = ((xt - mean) ** 2).mean(-1, keepdims=True)
    xn = (xt - mean) / jnp.sqrt(var + eps) * params["gamma"] + params["beta"]
    xn = jnp.transpose(xn, (0, 3, 1, 2))                                  # NCHW

    x1 = jax.lax.conv_general_dilated(
        xn, params["dw_w"], window_strides=(1, 1), padding=((1, 1), (1, 1)),
        dimension_numbers=("NCHW", "OIHW", "NCHW"),
        feature_group_count=C) + params["dw_b"].reshape(1, C, 1, 1)

    pooled = xn.mean(axis=(2, 3))                                         # (B, C)
    h = jax.nn.relu(pooled @ params["w1"].T + params["b1"])               # (B, Cr)
    se = jnp.tanh(h @ params["w2"].T + params["b2"])                      # (B, C)
    x2 = xn * se[:, :, None, None]
    return x1 * x2 + x


if __name__ == "__main__":
    key = jax.random.PRNGKey(0)
    keys = jax.random.split(key, 9)

    B, C, H, W = 2, 32, 16, 16       # filters = 32  ->  SE hidden = 32 // 16 = 2
    Cr = C // 16

    x = jax.random.normal(keys[0], (B, C, H, W), jnp.float32)
    params = {
        "gamma": 1.0 + 0.1 * jax.random.normal(keys[1], (C,), jnp.float32),
        "beta": 0.1 * jax.random.normal(keys[2], (C,), jnp.float32),
        "dw_w": jax.random.normal(keys[3], (C, 1, 3, 3), jnp.float32) * math.sqrt(2.0 / 9.0),
        "dw_b": 0.1 * jax.random.normal(keys[4], (C,), jnp.float32),
        "w1": jax.random.normal(keys[5], (Cr, C), jnp.float32) * math.sqrt(2.0 / C),
        "b1": 0.1 * jax.random.normal(keys[6], (Cr,), jnp.float32),
        "w2": jax.random.normal(keys[7], (C, Cr), jnp.float32) * math.sqrt(2.0 / Cr),
        "b2": 0.1 * jax.random.normal(keys[8], (C,), jnp.float32),
    }

    forward = jax.jit(msef_forward)
    out = jax.block_until_ready(forward(x, params))

    ref = msef_reference(x, params)
    assert out.shape == (B, C, H, W), out.shape
    assert jnp.allclose(out, ref, atol=1e-4, rtol=1e-4), "mismatch vs reference"

    print("KERNEL_OK")
</pallas_src>

<mosaic_0001>
module attributes {stable_mosaic.version = 11 : i64} {
  func.func @msef_kernel(%arg0: i32, %arg1: memref<1x16x16x32xf32, #tpu.memory_space<vmem>>, %arg2: memref<13x32xf32, #tpu.memory_space<vmem>>, %arg3: memref<4x32xf32, #tpu.memory_space<vmem>>, %arg4: memref<2x1xf32, #tpu.memory_space<vmem>>, %arg5: memref<1x16x16x32xf32, #tpu.memory_space<vmem>>, %arg6: memref<18x18x32xf32, #tpu.memory_space<vmem>>) attributes {dimension_semantics = [#tpu.dimension_semantics<parallel>], iteration_bounds = array<i64: 2>, scalar_prefetch = 0 : i64, scratch_operands = 1 : i64, tpu.core_type = #tpu.core_type<tc>, window_params = [{transform_indices = @transform_0, window_bounds = array<i64: 1, 16, 16, 32>}, {pipeline_mode = #tpu.pipeline_mode<synchronous>, transform_indices = @transform_1, window_bounds = array<i64: 13, 32>}, {pipeline_mode = #tpu.pipeline_mode<synchronous>, transform_indices = @transform_2, window_bounds = array<i64: 4, 32>}, {pipeline_mode = #tpu.pipeline_mode<synchronous>, transform_indices = @transform_3, window_bounds = array<i64: 2, 1>}, {transform_indices = @transform_4, window_bounds = array<i64: 1, 16, 16, 32>}]} {
    %c0 = arith.constant 0 : index
    %c0_0 = arith.constant 0 : index
    %c0_1 = arith.constant 0 : index
    %c0_2 = arith.constant 0 : index
    %0 = vector.load %arg1[%c0, %c0_0, %c0_1, %c0_2] : memref<1x16x16x32xf32, #tpu.memory_space<vmem>>, vector<1x16x16x32xf32>
    %1 = vector.shape_cast %0 : vector<1x16x16x32xf32> to vector<16x16x32xf32>
    %c0_3 = arith.constant 0 : index
    %c0_4 = arith.constant 0 : index
    %2 = vector.load %arg2[%c0_3, %c0_4] : memref<13x32xf32, #tpu.memory_space<vmem>>, vector<1x32xf32>
    %c1 = arith.constant 1 : index
    %c0_5 = arith.constant 0 : index
    %3 = vector.load %arg2[%c1, %c0_5] : memref<13x32xf32, #tpu.memory_space<vmem>>, vector<1x32xf32>
    %c2 = arith.constant 2 : index
    %c0_6 = arith.constant 0 : index
    %4 = vector.load %arg2[%c2, %c0_6] : memref<13x32xf32, #tpu.memory_space<vmem>>, vector<1x32xf32>
    %c3 = arith.constant 3 : index
    %c0_7 = arith.constant 0 : index
    %5 = vector.load %arg2[%c3, %c0_7] : memref<13x32xf32, #tpu.memory_space<vmem>>, vector<1x32xf32>
    %cst = arith.constant dense<0.000000e+00> : vector<16x16xf32>
    %6 = vector.multi_reduction <add>, %1, %cst [2] : vector<16x16x32xf32> to vector<16x16xf32>
    %7 = vector.shape_cast %6 : vector<16x16xf32> to vector<16x16x1xf32>
    %cst_8 = arith.constant 3.200000e+01 : f32
    %8 = vector.broadcast %cst_8 : f32 to vector<16x16x1xf32>
    %9 = arith.divf %7, %8 : vector<16x16x1xf32>
    %10 = vector.broadcast %9 : vector<16x16x1xf32> to vector<16x16x32xf32>
    %11 = arith.subf %1, %10 : vector<16x16x32xf32>
    %12 = arith.mulf %11, %11 : vector<16x16x32xf32>
    %cst_9 = arith.constant dense<0.000000e+00> : vector<16x16xf32>
    %13 = vector.multi_reduction <add>, %12, %cst_9 [2] : vector<16x16x32xf32> to vector<16x16xf32>
    %14 = vector.shape_cast %13 : vector<16x16xf32> to vector<16x16x1xf32>
    %cst_10 = arith.constant 3.200000e+01 : f32
    %15 = vector.broadcast %cst_10 : f32 to vector<16x16x1xf32>
    %16 = arith.divf %14, %15 : vector<16x16x1xf32>
    %cst_11 = arith.constant 9.99999974E-6 : f32
    %17 = vector.broadcast %cst_11 : f32 to vector<16x16x1xf32>
    %18 = arith.addf %16, %17 : vector<16x16x1xf32>
    %19 = math.rsqrt %18 : vector<16x16x1xf32>
    %20 = vector.broadcast %19 : vector<16x16x1xf32> to vector<16x16x32xf32>
    %21 = arith.mulf %11, %20 : vector<16x16x32xf32>
    %22 = vector.shape_cast %2 : vector<1x32xf32> to vector<1x1x32xf32>
    %23 = vector.broadcast %22 : vector<1x1x32xf32> to vector<16x16x32xf32>
    %24 = arith.mulf %21, %23 : vector<16x16x32xf32>
    %25 = vector.shape_cast %3 : vector<1x32xf32> to vector<1x1x32xf32>
    %26 = vector.broadcast %25 : vector<1x1x32xf32> to vector<16x16x32xf32>
    %27 = arith.addf %24, %26 : vector<16x16x32xf32>
    %cst_12 = arith.constant dense<0.000000e+00> : vector<16x32xf32>
    %28 = vector.multi_reduction <add>, %27, %cst_12 [0] : vector<16x16x32xf32> to vector<16x32xf32>
    %cst_13 = arith.constant 1.600000e+01 : f32
    %29 = vector.broadcast %cst_13 : f32 to vector<16x32xf32>
    %30 = arith.divf %28, %29 : vector<16x32xf32>
    %cst_14 = arith.constant dense<0.000000e+00> : vector<32xf32>
    %31 = vector.multi_reduction <add>, %30, %cst_14 [0] : vector<16x32xf32> to vector<32xf32>
    %32 = vector.shape_cast %31 : vector<32xf32> to vector<1x32xf32>
    %cst_15 = arith.constant 1.600000e+01 : f32
    %33 = vector.broadcast %cst_15 : f32 to vector<1x32xf32>
    %34 = arith.divf %32, %33 : vector<1x32xf32>
    %c0_16 = arith.constant 0 : index
    %c0_17 = arith.constant 0 : index
    %35 = vector.load %arg3[%c0_16, %c0_17] : memref<4x32xf32, #tpu.memory_space<vmem>>, vector<2x32xf32>
    %c2_18 = arith.constant 2 : index
    %c0_19 = arith.constant 0 : index
    %36 = vector.load %arg3[%c2_18, %c0_19] : memref<4x32xf32, #tpu.memory_space<vmem>>, vector<2x32xf32>
    %37 = vector.broadcast %34 : vector<1x32xf32> to vector<2x32xf32>
    %38 = arith.mulf %35, %37 : vector<2x32xf32>
    %cst_20 = arith.constant dense<0.000000e+00> : vector<2xf32>
    %39 = vector.multi_reduction <add>, %38, %cst_20 [1] : vector<2x32xf32> to vector<2xf32>
    %40 = vector.shape_cast %39 : vector<2xf32> to vector<2x1xf32>
    %c0_21 = arith.constant 0 : index
    %c0_22 = arith.constant 0 : index
    %41 = vector.load %arg4[%c0_21, %c0_22] : memref<2x1xf32, #tpu.memory_space<vmem>>, vector<2x1xf32>
    %42 = arith.addf %40, %41 : vector<2x1xf32>
    %cst_23 = arith.constant 0.000000e+00 : f32
    %43 = vector.broadcast %cst_23 : f32 to vector<2x1xf32>
    %44 = arith.maximumf %42, %43 : vector<2x1xf32>
    %45 = vector.broadcast %44 : vector<2x1xf32> to vector<2x32xf32>
    %46 = arith.mulf %36, %45 : vector<2x32xf32>
    %cst_24 = arith.constant dense<0.000000e+00> : vector<32xf32>
    %47 = vector.multi_reduction <add>, %46, %cst_24 [0] : vector<2x32xf32> to vector<32xf32>
    %48 = vector.shape_cast %47 : vector<32xf32> to vector<1x32xf32>
    %49 = arith.addf %48, %5 : vector<1x32xf32>
    %50 = math.tanh %49 : vector<1x32xf32>
    %cst_25 = arith.constant 0.000000e+00 : f32
    %51 = vector.broadcast %cst_25 : f32 to vector<18x18x32xf32>
    %c0_26 = arith.constant 0 : index
    %c0_27 = arith.constant 0 : index
    %c0_28 = arith.constant 0 : index
    %52 = vector.load %arg6[%c0_26, %c0_27, %c0_28] : memref<18x18x32xf32, #tpu.memory_space<vmem>>, vector<18x18x32xf32>
    tpu.vector_store %arg6[%c0_26, %c0_27, %c0_28], %51 {strides = array<i32>} : memref<18x18x32xf32, #tpu.memory_space<vmem>>, vector<18x18x32xf32>,
    %c1_29 = arith.constant 1 : index
    %c1_30 = arith.constant 1 : index
    %c0_31 = arith.constant 0 : index
    %53 = vector.load %arg6[%c1_29, %c1_30, %c0_31] : memref<18x18x32xf32, #tpu.memory_space<vmem>>, vector<16x16x32xf32>
    tpu.vector_store %arg6[%c1_29, %c1_30, %c0_31], %27 {strides = array<i32>} : memref<18x18x32xf32, #tpu.memory_space<vmem>>, vector<16x16x32xf32>,
    %cst_32 = arith.constant 0.000000e+00 : f32
    %54 = vector.broadcast %cst_32 : f32 to vector<16x16x32xf32>
    %55 = vector.shape_cast %4 : vector<1x32xf32> to vector<1x1x32xf32>
    %56 = vector.broadcast %55 : vector<1x1x32xf32> to vector<16x16x32xf32>
    %57 = arith.addf %54, %56 : vector<16x16x32xf32>
    %c0_33 = arith.constant 0 : index
    %c0_34 = arith.constant 0 : index
    %c0_35 = arith.constant 0 : index
    %58 = vector.load %arg6[%c0_33, %c0_34, %c0_35] : memref<18x18x32xf32, #tpu.memory_space<vmem>>, vector<16x16x32xf32>
    %c4 = arith.constant 4 : index
    %c0_36 = arith.constant 0 : index
    %59 = vector.load %arg2[%c4, %c0_36] : memref<13x32xf32, #tpu.memory_space<vmem>>, vector<1x32xf32>
    %60 = vector.shape_cast %59 : vector<1x32xf32> to vector<1x1x32xf32>
    %61 = vector.broadcast %60 : vector<1x1x32xf32> to vector<16x16x32xf32>
    %62 = arith.mulf %58, %61 : vector<16x16x32xf32>
    %63 = arith.addf %57, %62 : vector<16x16x32xf32>
    %c0_37 = arith.constant 0 : index
    %c1_38 = arith.constant 1 : index
    %c0_39 = arith.constant 0 : index
    %64 = vector.load %arg6[%c0_37, %c1_38, %c0_39] : memref<18x18x32xf32, #tpu.memory_space<vmem>>, vector<16x16x32xf32>
    %c5 = arith.constant 5 : index
    %c0_40 = arith.constant 0 : index
    %65 = vector.load %arg2[%c5, %c0_40] : memref<13x32xf32, #tpu.memory_space<vmem>>, vector<1x32xf32>
    %66 = vector.shape_cast %65 : vector<1x32xf32> to vector<1x1x32xf32>
    %67 = vector.broadcast %66 : vector<1x1x32xf32> to vector<16x16x32xf32>
    %68 = arith.mulf %64, %67 : vector<16x16x32xf32>
    %69 = arith.addf %63, %68 : vector<16x16x32xf32>
    %c0_41 = arith.constant 0 : index
    %c2_42 = arith.constant 2 : index
    %c0_43 = arith.constant 0 : index
    %70 = vector.load %arg6[%c0_41, %c2_42, %c0_43] : memref<18x18x32xf32, #tpu.memory_space<vmem>>, vector<16x16x32xf32>
    %c6 = arith.constant 6 : index
    %c0_44 = arith.constant 0 : index
    %71 = vector.load %arg2[%c6, %c0_44] : memref<13x32xf32, #tpu.memory_space<vmem>>, vector<1x32xf32>
    %72 = vector.shape_cast %71 : vector<1x32xf32> to vector<1x1x32xf32>
    %73 = vector.broadcast %72 : vector<1x1x32xf32> to vector<16x16x32xf32>
    %74 = arith.mulf %70, %73 : vector<16x16x32xf32>
    %75 = arith.addf %69, %74 : vector<16x16x32xf32>
    %c1_45 = arith.constant 1 : index
    %c0_46 = arith.constant 0 : index
    %c0_47 = arith.constant 0 : index
    %76 = vector.load %arg6[%c1_45, %c0_46, %c0_47] : memref<18x18x32xf32, #tpu.memory_space<vmem>>, vector<16x16x32xf32>
    %c7 = arith.constant 7 : index
    %c0_48 = arith.constant 0 : index
    %77 = vector.load %arg2[%c7, %c0_48] : memref<13x32xf32, #tpu.memory_space<vmem>>, vector<1x32xf32>
    %78 = vector.shape_cast %77 : vector<1x32xf32> to vector<1x1x32xf32>
    %79 = vector.broadcast %78 : vector<1x1x32xf32> to vector<16x16x32xf32>
    %80 = arith.mulf %76, %79 : vector<16x16x32xf32>
    %81 = arith.addf %75, %80 : vector<16x16x32xf32>
    %c1_49 = arith.constant 1 : index
    %c1_50 = arith.constant 1 : index
    %c0_51 = arith.constant 0 : index
    %82 = vector.load %arg6[%c1_49, %c1_50, %c0_51] : memref<18x18x32xf32, #tpu.memory_space<vmem>>, vector<16x16x32xf32>
    %c8 = arith.constant 8 : index
    %c0_52 = arith.constant 0 : index
    %83 = vector.load %arg2[%c8, %c0_52] : memref<13x32xf32, #tpu.memory_space<vmem>>, vector<1x32xf32>
    %84 = vector.shape_cast %83 : vector<1x32xf32> to vector<1x1x32xf32>
    %85 = vector.broadcast %84 : vector<1x1x32xf32> to vector<16x16x32xf32>
    %86 = arith.mulf %82, %85 : vector<16x16x32xf32>
    %87 = arith.addf %81, %86 : vector<16x16x32xf32>
    %c1_53 = arith.constant 1 : index
    %c2_54 = arith.constant 2 : index
    %c0_55 = arith.constant 0 : index
    %88 = vector.load %arg6[%c1_53, %c2_54, %c0_55] : memref<18x18x32xf32, #tpu.memory_space<vmem>>, vector<16x16x32xf32>
    %c9 = arith.constant 9 : index
    %c0_56 = arith.constant 0 : index
    %89 = vector.load %arg2[%c9, %c0_56] : memref<13x32xf32, #tpu.memory_space<vmem>>, vector<1x32xf32>
    %90 = vector.shape_cast %89 : vector<1x32xf32> to vector<1x1x32xf32>
    %91 = vector.broadcast %90 : vector<1x1x32xf32> to vector<16x16x32xf32>
    %92 = arith.mulf %88, %91 : vector<16x16x32xf32>
    %93 = arith.addf %87, %92 : vector<16x16x32xf32>
    %c2_57 = arith.constant 2 : index
    %c0_58 = arith.constant 0 : index
    %c0_59 = arith.constant 0 : index
    %94 = vector.load %arg6[%c2_57, %c0_58, %c0_59] : memref<18x18x32xf32, #tpu.memory_space<vmem>>, vector<16x16x32xf32>
    %c10 = arith.constant 10 : index
    %c0_60 = arith.constant 0 : index
    %95 = vector.load %arg2[%c10, %c0_60] : memref<13x32xf32, #tpu.memory_space<vmem>>, vector<1x32xf32>
    %96 = vector.shape_cast %95 : vector<1x32xf32> to vector<1x1x32xf32>
    %97 = vector.broadcast %96 : vector<1x1x32xf32> to vector<16x16x32xf32>
    %98 = arith.mulf %94, %97 : vector<16x16x32xf32>
    %99 = arith.addf %93, %98 : vector<16x16x32xf32>
    %c2_61 = arith.constant 2 : index
    %c1_62 = arith.constant 1 : index
    %c0_63 = arith.constant 0 : index
    %100 = vector.load %arg6[%c2_61, %c1_62, %c0_63] : memref<18x18x32xf32, #tpu.memory_space<vmem>>, vector<16x16x32xf32>
    %c11 = arith.constant 11 : index
    %c0_64 = arith.constant 0 : index
    %101 = vector.load %arg2[%c11, %c0_64] : memref<13x32xf32, #tpu.memory_space<vmem>>, vector<1x32xf32>
    %102 = vector.shape_cast %101 : vector<1x32xf32> to vector<1x1x32xf32>
    %103 = vector.broadcast %102 : vector<1x1x32xf32> to vector<16x16x32xf32>
    %104 = arith.mulf %100, %103 : vector<16x16x32xf32>
    %105 = arith.addf %99, %104 : vector<16x16x32xf32>
    %c2_65 = arith.constant 2 : index
    %c2_66 = arith.constant 2 : index
    %c0_67 = arith.constant 0 : index
    %106 = vector.load %arg6[%c2_65, %c2_66, %c0_67] : memref<18x18x32xf32, #tpu.memory_space<vmem>>, vector<16x16x32xf32>
    %c12 = arith.constant 12 : index
    %c0_68 = arith.constant 0 : index
    %107 = vector.load %arg2[%c12, %c0_68] : memref<13x32xf32, #tpu.memory_space<vmem>>, vector<1x32xf32>
    %108 = vector.shape_cast %107 : vector<1x32xf32> to vector<1x1x32xf32>
    %109 = vector.broadcast %108 : vector<1x1x32xf32> to vector<16x16x32xf32>
    %110 = arith.mulf %106, %109 : vector<16x16x32xf32>
    %111 = arith.addf %105, %110 : vector<16x16x32xf32>
    %112 = vector.shape_cast %50 : vector<1x32xf32> to vector<1x1x32xf32>
    %113 = vector.broadcast %112 : vector<1x1x32xf32> to vector<16x16x32xf32>
    %114 = arith.mulf %27, %113 : vector<16x16x32xf32>
    %115 = arith.mulf %111, %114 : vector<16x16x32xf32>
    %116 = arith.addf %115, %1 : vector<16x16x32xf32>
    %c0_69 = arith.constant 0 : index
    %c0_70 = arith.constant 0 : index
    %c0_71 = arith.constant 0 : index
    %c0_72 = arith.constant 0 : index
    %117 = vector.load %arg5[%c0_69, %c0_70, %c0_71, %c0_72] : memref<1x16x16x32xf32, #tpu.memory_space<vmem>>, vector<1x16x16x32xf32>
    %118 = vector.shape_cast %117 : vector<1x16x16x32xf32> to vector<16x16x32xf32>
    %119 = vector.shape_cast %116 : vector<16x16x32xf32> to vector<1x16x16x32xf32>
    tpu.vector_store %arg5[%c0_69, %c0_70, %c0_71, %c0_72], %119 {strides = array<i32>} : memref<1x16x16x32xf32, #tpu.memory_space<vmem>>, vector<1x16x16x32xf32>,
    return
  }
  func.func @transform_0(%arg0: i32) -> (i32, i32, i32, i32) {
    %c0_i32 = arith.constant 0 : i32
    %c0_i32_0 = arith.constant 0 : i32
    %c0_i32_1 = arith.constant 0 : i32
    %c0_i32_2 = arith.constant 0 : i32
    return %arg0, %c0_i32, %c0_i32_0, %c0_i32_1 : i32, i32, i32, i32
  }
  func.func @transform_1(%arg0: i32) -> (i32, i32) {
    %c0_i32 = arith.constant 0 : i32
    %c0_i32_0 = arith.constant 0 : i32
    %c0_i32_1 = arith.constant 0 : i32
    return %c0_i32, %c0_i32_0 : i32, i32
  }
  func.func @transform_2(%arg0: i32) -> (i32, i32) {
    %c0_i32 = arith.constant 0 : i32
    %c0_i32_0 = arith.constant 0 : i32
    %c0_i32_1 = arith.constant 0 : i32
    return %c0_i32, %c0_i32_0 : i32, i32
  }
  func.func @transform_3(%arg0: i32) -> (i32, i32) {
    %c0_i32 = arith.constant 0 : i32
    %c0_i32_0 = arith.constant 0 : i32
    %c0_i32_1 = arith.constant 0 : i32
    return %c0_i32, %c0_i32_0 : i32, i32
  }
  func.func @transform_4(%arg0: i32) -> (i32, i32, i32, i32) {
    %c0_i32 = arith.constant 0 : i32
    %c0_i32_0 = arith.constant 0 : i32
    %c0_i32_1 = arith.constant 0 : i32
    %c0_i32_2 = arith.constant 0 : i32
    return %arg0, %c0_i32, %c0_i32_0, %c0_i32_1 : i32, i32, i32, i32
  }
}

</mosaic_0001>

<bundles_post_ra>
// kernel: msef_forward.1
= control target key start
LH: loop header
LB: loop body
LE: loop exit
PB: predicated region body
PF: predicated region fallthrough
CT: control target
= control target key end

     0   :  { %9 = vsyncpa [#allocation4], 0  ;;  %s4123_s0 = inlined_call_operand.hbm [shape: f32[2,16,16,32], index: 0, kind: input, shape index: {}]   ;;  %s4124_s1 = inlined_call_operand.vmem [shape: f32[13,32], index: 1, kind: input, shape index: {}]   ;;  %s4125_s2 = inlined_call_operand.vmem [shape: f32[4,32], index: 2, kind: input, shape index: {}]   ;;  %s4126_s3 = inlined_call_operand.vmem [shape: f32[2,1], index: 3, kind: input, shape index: {}]   ;;  %s4127_s4 = inlined_call_operand.hbm [shape: f32[2,16,16,32], index: 4, kind: output, shape index: {}]  }
   0x1   :  { %11 = vsyncpa [#allocation4 + $0x1], 0 }
   0x2   :  { %12 = vsyncpa [#allocation5], 0 }
   0x3   :  { %14 = vsyncpa [#allocation5 + $0x1], 0  ;;  %s2380_s15 = smov 0   ;;  %s2382_s16 = smov 0  }
   0x4   :  { %s2384_s17 = smov 0   ;;  %s2386_s18 = smov 0  }
   0x5 LB: > { %s2401_s19 = sadd.s32 4294967295, %s2345_s18   ;;  %s2063_s20 = sadd.s32 4294967294, %s2345_s18   ;;  %s2345_s18 = sphi %s2386_s18, %s4276_s18   ;;  %s2341_s17 = sphi %s2384_s17, %s4275_s17   ;;  %s2337_s16 = sphi %s2382_s16, %s4274_s16   ;;  %s2333_s15 = sphi %s2380_s15, %s4273_s15  }
   0x6   : > { %s2405_s21 = sadd.s32 1, %s2345_s18   ;;  %s27_s22 = sadd.s32 1, %s2341_s17 }
   0x7   : > { %s24_s23 = ssub.s32 %s2345_s18, %s2405_s21  ;;  %p34_p0 = scmp.ne.s32.totalorder %s2341_s17, %s2337_s16 }
   0x8   : > { %p25_p1 = scmp.eq.s32.totalorder %s24_s23, 0  ;;  %p35_p2 = scmp.eq.s32.totalorder %s2345_s18, 0 }
   0x9   : > { %p40_p3 = scmp.ne.s32.totalorder %s2337_s16, %s2333_s15  ;;  %p41_p4 = scmp.eq.s32.totalorder %s2401_s19, 0 }
   0xa   : > { %s2417_s24 = scalar_select %p25_p1, %s2341_s17, %s27_s22  }
   0xb   : > { %p2419_p5 = por %p35_p2, %p34_p0  ;;  %p2423_p6 = por %p41_p4, %p40_p3 }
   0xc   : > { %p127_p7 = scmp.eq.s32.totalorder %s2401_s19, 1  ;;  %p133_p8 = scmp.eq.s32.totalorder %s2063_s20, 1 }
   0xd   : > { %s4161_s26 = scalar_select %p2423_p6, 1, 0 }
   0xe   : > { %p2103_p10 = scmp.lt.s32.totalorder %s2345_s18, 2  ;;  %p2430_p11 = por %p127_p7, %p34_p0 }
   0xf   : > { %p2434_p12 = por %p133_p8, %p40_p3  ;;  %s162_s29 = sand.u32 1, %s2341_s17  }
  0x10   : > { %s4162_s27 = scalar_select %p2430_p11, 1, 0 }
  0x11   : > { %s4163_s28 = scalar_select %p2434_p12, 1, 0 }
  0x12   : > { %s2089_s30 = sshll.u32 %s2345_s18, 12  ;;  %s2066_s5 = sshll.u32 %s162_s29, 8 }
  0x13   : > { %s2443_s8 = scalar_lea.hbm %s4123_s0, %s2089_s30  ;;  %s166_s9 = scalar_lea.vmem [#allocation3], %s2066_s5 }
  0x14   : > { %s173_s10 = sshll.u32 %s166_s9, 4  ;;  %p2447_p13 = pnand %p2103_p10, %p2419_p5  ;;  %s2451_s10 = int_to_ptr.vmem [resolvable:$true] %s173_s10 }
  0x15   : > { %s2453_s12 = scalar_lea.sflag [#allocation4], %s162_s29  ;;  %s2253_s13 = scalar_lea.hbm %s2443_s8, 4096 }
  0x16   : > { %p2254_p0 = scmp.ne.s32.totalorder %s2443_s8, %s2253_s13  ;;  %p2255_p1 = pneg %p2447_p13 }
  0x17   : > { %s2258_s22 = scalar_lea.hbm %s4123_s0, 8192  ;;  %p2259_p4 = scmp.lt.s32.totalorder %s2443_s8, %s4123_s0 }
  0x18   : > { %p2256_p2 = pnand %p2255_p1, %p2254_p0  ;;  %p2260_p5 = scmp.lt.s32.totalorder %s2258_s22, %s2253_s13 }
  0x1a   : > { %p2257_p3 = pneg %p2256_p2  ;;  %p2261_p7 = por %p2260_p5, %p2259_p4 }
  0x1c   : > { %p2262_p8 = pnand %p2261_p7, %p2257_p3 }
  0x1e   : > { %2265 = shalt.err (!%p2262_p8)
}
  0x1f   : > { %s2266_s29 = scalar_lea.vmem %s2451_s10, 4096  ;;  %s2347_s30 = smov [#allocation3]  }
  0x20   : > { %p2267_p10 = scmp.ne.s32.totalorder %s2451_s10, %s2266_s29  ;;  %s2271_s5 = sshll.u32 %s2347_s30, 4  ;;  %s2272_s5 = int_to_ptr.vmem [resolvable:$false] %s2271_s5 }
  0x21   : > { %s2273_s6 = scalar_lea.vmem %s2272_s5, 8192  ;;  %p2274_p2 = scmp.lt.s32.totalorder %s2451_s10, %s2272_s5 }
  0x22   : > { %p2269_p9 = pnand %p2267_p10, %p2255_p1  ;;  %p2275_p12 = scmp.lt.s32.totalorder %s2273_s6, %s2266_s29 }
  0x24   : > { %p2270_p0 = pneg %p2269_p9  ;;  %p2276_p11 = por %p2275_p12, %p2274_p2 }
  0x26   : > { %p2277_p6 = pnand %p2276_p11, %p2270_p0 }
  0x28   : > { %2280 = shalt.err (!%p2277_p6)
}
  0x29   : > { %s2348_s7 = smov 128   ;;  %s2349_s9 = smov 8  }
  0x2a   : > { %2098 = dma.hbm_to_vmem [thread:$0]  (!%p2447_p13), %s2443_s8, 4096, %s2451_s10, %s2453_s12, %s2348_s7, %s2348_s7, %s2349_s9  }
  0x2b   : > { %p2069_p9 = scmp.ge.s32.totalorder %s2345_s18, 1  ;;  %p181_p1 = scmp.lt.s32.totalorder %s2345_s18, 3 }
  0x2d   : > { %p182_p3 = pnand %p2069_p9, %p181_p1 }
  0x2f   : > { %185 = sbr.rel (%p182_p3) target bundleno = 858 (0x35a), region = 36 }
  0x34   : > { %s2477_s13 = sand.u32 1, %s2337_s16   ;;  %p4165_p6 = scmp.ne.s32.totalorder %s4161_s26, 0 }
  0x35   : > { %s2070_s14 = sshll.u32 %s2477_s13, 8  ;;  %s188_s20 = scalar_lea.sflag [#allocation4], %s2477_s13 }
  0x36   : > { %s2483_s22 = scalar_lea.vmem [#allocation3], %s2070_s14 }
  0x37   : > { %2324 = dma.done.wait (%p4165_p6), %s188_s20, 4096  }
  0x38   : > { %2326 = vsyncadd (%p4165_p6), %s188_s20, 4294963200  ;;  %vm252_vm0 = vcmask 261120   ;;  %v2490_v0 = vld [vmem:[%s2483_s22] sm:$0xff]  ;;  %v2493_v1 = vld [vmem:[%s2483_s22 + $0x10] sm:$0xff]  ;;  %vm820_vm1 = vcmask 254976   ;;  %s3970_s6 = scalar_lea.vmem [#allocation6], %s2070_s14 }
  0x39   : > { %v2496_v2 = vld [vmem:[%s2483_s22 + $0x8] sm:$0xff]  ;;  %v253_v3 = vsel %vm252_vm0, %v2490_v0, 0.0  ;;  %v259_v4 = vsel %vm252_vm0, %v2493_v1, 0.0  ;;  %v2503_v5 = vld [vmem:[%s2483_s22 + $0x18] sm:$0xff]  ;;  %v2510_v8 = vld [vmem:[%s2483_s22 + $0x20] sm:$0xff]  ;;  %s2090_s14 = sshll.u32 %s2401_s19, 12 }
  0x3a   : > { %254 = vadd.xlane.f32.xlu0 %v253_v3  ;;  %260 = vadd.xlane.f32.xlu1 %v259_v4  ;;  %v256_v6 = vsel %vm252_vm0, %v2496_v2, 0.0  ;;  %v262_v7 = vsel %vm252_vm0, %v2503_v5, 0.0  ;;  %v2513_v9 = vld [vmem:[%s2483_s22 + $0x28] sm:$0xff]  ;;  %v265_v10 = vsel %vm252_vm0, %v2510_v8, 0.0  ;;  %v2520_v12 = vld [vmem:[%s2483_s22 + $0x30] sm:$0xff]  ;;  %v2523_v13 = vld [vmem:[%s2483_s22 + $0x38] sm:$0xff]  ;;  %s4044_s26 = scalar_lea.hbm %s4127_s4, %s2090_s14 }
  0x3b   : > { %v268_v11 = vsel %vm252_vm0, %v2513_v9, 0.0  ;;  %v271_v14 = vsel %vm252_vm0, %v2520_v12, 0.0  ;;  %v274_v15 = vsel %vm252_vm0, %v2523_v13, 0.0  ;;  %v2530_v16 = vld [vmem:[%s2483_s22 + $0x40] sm:$0xff]  ;;  %v2533_v17 = vld [vmem:[%s2483_s22 + $0x48] sm:$0xff]  ;;  %v2540_v20 = vld [vmem:[%s2483_s22 + $0x50] sm:$0xff] }
  0x3c   : > { %v277_v18 = vsel %vm252_vm0, %v2530_v16, 0.0  ;;  %v280_v19 = vsel %vm252_vm0, %v2533_v17, 0.0  ;;  %v2543_v21 = vld [vmem:[%s2483_s22 + $0x58] sm:$0xff]  ;;  %v283_v22 = vsel %vm252_vm0, %v2540_v20, 0.0  ;;  %v2550_v24 = vld [vmem:[%s2483_s22 + $0x60] sm:$0xff]  ;;  %v2553_v25 = vld [vmem:[%s2483_s22 + $0x68] sm:$0xff] }
  0x3d   : > { %v286_v23 = vsel %vm252_vm0, %v2543_v21, 0.0  ;;  %v289_v26 = vsel %vm252_vm0, %v2550_v24, 0.0  ;;  %v292_v27 = vsel %vm252_vm0, %v2553_v25, 0.0  ;;  %v2560_v28 = vld [vmem:[%s2483_s22 + $0x70] sm:$0xff]  ;;  %v2563_v29 = vld [vmem:[%s2483_s22 + $0x78] sm:$0xff]  ;;  %v2570_v32 = vld [vmem:[%s2483_s22 + $0x80] sm:$0xff] }
  0x3e   : > { %257 = vadd.xlane.f32.xlu0 %v256_v6  ;;  %263 = vadd.xlane.f32.xlu1 %v262_v7  ;;  %v295_v30 = vsel %vm252_vm0, %v2560_v28, 0.0  ;;  %v298_v31 = vsel %vm252_vm0, %v2563_v29, 0.0  ;;  %v2573_v33 = vld [vmem:[%s2483_s22 + $0x88] sm:$0xff]  ;;  %v301_v34 = vsel %vm252_vm0, %v2570_v32, 0.0  ;;  %v2580_v36 = vld [vmem:[%s2483_s22 + $0x90] sm:$0xff]  ;;  %v2583_v37 = vld [vmem:[%s2483_s22 + $0x98] sm:$0xff] }
  0x3f   : > { %v304_v35 = vsel %vm252_vm0, %v2573_v33, 0.0  ;;  %v307_v38 = vsel %vm252_vm0, %v2580_v36, 0.0  ;;  %v310_v39 = vsel %vm252_vm0, %v2583_v37, 0.0  ;;  %v2590_v40 = vld [vmem:[%s2483_s22 + $0xa0] sm:$0xff]  ;;  %v2593_v41 = vld [vmem:[%s2483_s22 + $0xa8] sm:$0xff]  ;;  %v2600_v44 = vld [vmem:[%s2483_s22 + $0xb0] sm:$0xff] }
  0x40   : > { %v313_v42 = vsel %vm252_vm0, %v2590_v40, 0.0  ;;  %v316_v43 = vsel %vm252_vm0, %v2593_v41, 0.0  ;;  %v2603_v45 = vld [vmem:[%s2483_s22 + $0xb8] sm:$0xff]  ;;  %v319_v46 = vsel %vm252_vm0, %v2600_v44, 0.0  ;;  %v2610_v48 = vld [vmem:[%s2483_s22 + $0xc0] sm:$0xff]  ;;  %v2613_v49 = vld [vmem:[%s2483_s22 + $0xc8] sm:$0xff] }
  0x41   : > { %v322_v47 = vsel %vm252_vm0, %v2603_v45, 0.0  ;;  %v325_v50 = vsel %vm252_vm0, %v2610_v48, 0.0  ;;  %v328_v51 = vsel %vm252_vm0, %v2613_v49, 0.0  ;;  %v2620_v52 = vld [vmem:[%s2483_s22 + $0xd0] sm:$0xff]  ;;  %v2623_v53 = vld [vmem:[%s2483_s22 + $0xd8] sm:$0xff]  ;;  %v2630_v56 = vld [vmem:[%s2483_s22 + $0xe0] sm:$0xff] }
  0x42   : > { %266 = vadd.xlane.f32.xlu0 %v265_v10  ;;  %269 = vadd.xlane.f32.xlu1 %v268_v11  ;;  %v331_v54 = vsel %vm252_vm0, %v2620_v52, 0.0  ;;  %v334_v55 = vsel %vm252_vm0, %v2623_v53, 0.0  ;;  %v2633_v57 = vld [vmem:[%s2483_s22 + $0xe8] sm:$0xff]  ;;  %v337_v58 = vsel %vm252_vm0, %v2630_v56, 0.0  ;;  %v2640_v60 = vld [vmem:[%s2483_s22 + $0xf0] sm:$0xff]  ;;  %v2643_v61 = vld [vmem:[%s2483_s22 + $0xf8] sm:$0xff] }
  0x43   : > { %v340_v59 = vsel %vm252_vm0, %v2633_v57, 0.0  ;;  %v343_v62 = vsel %vm252_vm0, %v2640_v60, 0.0  ;;  %v346_v63 = vsel %vm252_vm0, %v2643_v61, 0.0  ;;  %v2350_v3 = vmov 0.0   ;;  %s1990_s7 = sshll.u32 %s3970_s6, 4  ;;  %s1977_s19 = scalar_lea.sflag [#allocation5], %s2477_s13  ;;  %s4048_s7 = int_to_ptr.vmem [resolvable:$true] %s1990_s7 }
  0x44   : > { %842 = vst.msk [vmem:[#allocation2] sm:$0xff] %vm252_vm0, %v2350_v3  ;;  %843 = vst.msk [vmem:[#allocation2 + $0x8] sm:$0xff] %vm252_vm0, %v2350_v3  ;;  %p4270_p12 = scmp.ne.s32.totalorder %s4162_s27, 0  ;;  %s2352_s8 = smov [#allocation6]  }
  0x45   : > { %845 = vst.msk [vmem:[#allocation2 + $0x18] sm:$0xff] %vm252_vm0, %v2350_v3  ;;  %846 = vst.msk [vmem:[#allocation2 + $0x20] sm:$0xff] %vm252_vm0, %v2350_v3  ;;  %s2285_s10 = sshll.u32 %s2352_s8, 4  ;;  %s2286_s10 = int_to_ptr.vmem [resolvable:$false] %s2285_s10 }
  0x46   : > { %272 = vadd.xlane.f32.xlu0 %v271_v14  ;;  %275 = vadd.xlane.f32.xlu1 %v274_v15  ;;  %848 = vst.msk [vmem:[#allocation2 + $0x30] sm:$0xff] %vm252_vm0, %v2350_v3  ;;  %849 = vst.msk [vmem:[#allocation2 + $0x38] sm:$0xff] %vm252_vm0, %v2350_v3  ;;  %s2287_s11 = scalar_lea.vmem %s2286_s10, 8192  ;;  %p2288_p5 = scmp.lt.s32.totalorder %s4048_s7, %s2286_s10 }
  0x47   : > { %851 = vst.msk [vmem:[#allocation2 + $0x48] sm:$0xff] %vm252_vm0, %v2350_v3  ;;  %852 = vst.msk [vmem:[#allocation2 + $0x50] sm:$0xff] %vm252_vm0, %v2350_v3 }
  0x48   : > { %854 = vst.msk [vmem:[#allocation2 + $0x60] sm:$0xff] %vm252_vm0, %v2350_v3  ;;  %855 = vst.msk [vmem:[#allocation2 + $0x68] sm:$0xff] %vm252_vm0, %v2350_v3 }
  0x49   : > { %857 = vst.msk [vmem:[#allocation2 + $0x78] sm:$0xff] %vm252_vm0, %v2350_v3  ;;  %858 = vst.msk [vmem:[#allocation2 + $0x80] sm:$0xff] %vm252_vm0, %v2350_v3 }
  0x4a   : > { %278 = vadd.xlane.f32.xlu0 %v277_v18  ;;  %281 = vadd.xlane.f32.xlu1 %v280_v19  ;;  %860 = vst.msk [vmem:[#allocation2 + $0x90] sm:$0xff] %vm252_vm0, %v2350_v3  ;;  %861 = vst.msk [vmem:[#allocation2 + $0x98] sm:$0xff] %vm252_vm0, %v2350_v3 }
  0x4b   : > { %863 = vst.msk [vmem:[#allocation2 + $0xa8] sm:$0xff] %vm252_vm0, %v2350_v3  ;;  %864 = vst.msk [vmem:[#allocation2 + $0xb0] sm:$0xff] %vm252_vm0, %v2350_v3 }
  0x4c   : > { %866 = vst.msk [vmem:[#allocation2 + $0xc0] sm:$0xff] %vm252_vm0, %v2350_v3  ;;  %867 = vst.msk [vmem:[#allocation2 + $0xc8] sm:$0xff] %vm252_vm0, %v2350_v3 }
  0x4d   : > { %869 = vst.msk [vmem:[#allocation2 + $0xd8] sm:$0xff] %vm252_vm0, %v2350_v3  ;;  %870 = vst.msk [vmem:[#allocation2 + $0xe0] sm:$0xff] %vm252_vm0, %v2350_v3 }
  0x4e   : > { %284 = vadd.xlane.f32.xlu0 %v283_v22  ;;  %287 = vadd.xlane.f32.xlu1 %v286_v23  ;;  %872 = vst.msk [vmem:[#allocation2 + $0xf0] sm:$0xff] %vm252_vm0, %v2350_v3  ;;  %873 = vst.msk [vmem:[#allocation2 + $0xf8] sm:$0xff] %vm252_vm0, %v2350_v3 }
  0x4f   : > { %875 = vst.msk [vmem:[#allocation2 + $0x108] sm:$0xff] %vm252_vm0, %v2350_v3  ;;  %876 = vst.msk [vmem:[#allocation2 + $0x110] sm:$0xff] %vm252_vm0, %v2350_v3 }
  0x50   : > { %878 = vst.msk [vmem:[#allocation2 + $0x120] sm:$0xff] %vm252_vm0, %v2350_v3  ;;  %879 = vst.msk [vmem:[#allocation2 + $0x128] sm:$0xff] %vm252_vm0, %v2350_v3 }
  0x51   : > { %881 = vst.msk [vmem:[#allocation2 + $0x138] sm:$0xff] %vm252_vm0, %v2350_v3  ;;  %882 = vst.msk [vmem:[#allocation2 + $0x140] sm:$0xff] %vm252_vm0, %v2350_v3 }
  0x52   : > { %290 = vadd.xlane.f32.xlu0 %v289_v26  ;;  %293 = vadd.xlane.f32.xlu1 %v292_v27  ;;  %884 = vst.msk [vmem:[#allocation2 + $0x150] sm:$0xff] %vm252_vm0, %v2350_v3  ;;  %885 = vst.msk [vmem:[#allocation2 + $0x158] sm:$0xff] %vm252_vm0, %v2350_v3 }
  0x53   : > { %887 = vst.msk [vmem:[#allocation2 + $0x168] sm:$0xff] %vm252_vm0, %v2350_v3  ;;  %888 = vst.msk [vmem:[#allocation2 + $0x170] sm:$0xff] %vm252_vm0, %v2350_v3 }
  0x54   : > { %890 = vst.msk [vmem:[#allocation2 + $0x180] sm:$0xff] %vm252_vm0, %v2350_v3  ;;  %891 = vst.msk [vmem:[#allocation2 + $0x188] sm:$0xff] %vm252_vm0, %v2350_v3 }
  0x55   : > { %893 = vst.msk [vmem:[#allocation2 + $0x198] sm:$0xff] %vm252_vm0, %v2350_v3  ;;  %894 = vst.msk [vmem:[#allocation2 + $0x1a0] sm:$0xff] %vm252_vm0, %v2350_v3 }
  0x56   : > { %296 = vadd.xlane.f32.xlu0 %v295_v30  ;;  %299 = vadd.xlane.f32.xlu1 %v298_v31  ;;  %844 = vst.msk [vmem:[#allocation2 + $0x10] sm:$0x3] %vm820_vm1, %v2350_v3  ;;  %847 = vst.msk [vmem:[#allocation2 + $0x28] sm:$0x3] %vm820_vm1, %v2350_v3 }
  0x57   : > { %850 = vst.msk [vmem:[#allocation2 + $0x40] sm:$0x3] %vm820_vm1, %v2350_v3  ;;  %853 = vst.msk [vmem:[#allocation2 + $0x58] sm:$0x3] %vm820_vm1, %v2350_v3 }
  0x58   : > { %856 = vst.msk [vmem:[#allocation2 + $0x70] sm:$0x3] %vm820_vm1, %v2350_v3  ;;  %859 = vst.msk [vmem:[#allocation2 + $0x88] sm:$0x3] %vm820_vm1, %v2350_v3 }
  0x59   : > { %862 = vst.msk [vmem:[#allocation2 + $0xa0] sm:$0x3] %vm820_vm1, %v2350_v3  ;;  %865 = vst.msk [vmem:[#allocation2 + $0xb8] sm:$0x3] %vm820_vm1, %v2350_v3 }
  0x5a   : > { %302 = vadd.xlane.f32.xlu0 %v301_v34  ;;  %305 = vadd.xlane.f32.xlu1 %v304_v35  ;;  %868 = vst.msk [vmem:[#allocation2 + $0xd0] sm:$0x3] %vm820_vm1, %v2350_v3  ;;  %871 = vst.msk [vmem:[#allocation2 + $0xe8] sm:$0x3] %vm820_vm1, %v2350_v3 }
  0x5b   : > { %874 = vst.msk [vmem:[#allocation2 + $0x100] sm:$0x3] %vm820_vm1, %v2350_v3  ;;  %877 = vst.msk [vmem:[#allocation2 + $0x118] sm:$0x3] %vm820_vm1, %v2350_v3 }
  0x5c   : > { %880 = vst.msk [vmem:[#allocation2 + $0x130] sm:$0x3] %vm820_vm1, %v2350_v3  ;;  %883 = vst.msk [vmem:[#allocation2 + $0x148] sm:$0x3] %vm820_vm1, %v2350_v3 }
  0x5d   : > { %886 = vst.msk [vmem:[#allocation2 + $0x160] sm:$0x3] %vm820_vm1, %v2350_v3  ;;  %889 = vst.msk [vmem:[#allocation2 + $0x178] sm:$0x3] %vm820_vm1, %v2350_v3 }
  0x5e   : > { %308 = vadd.xlane.f32.xlu0 %v307_v38  ;;  %311 = vadd.xlane.f32.xlu1 %v310_v39  ;;  %892 = vst.msk [vmem:[#allocation2 + $0x190] sm:$0x3] %vm820_vm1, %v2350_v3  ;;  %895 = vst.msk [vmem:[#allocation2 + $0x1a8] sm:$0x3] %vm820_vm1, %v2350_v3 }
  0x62   : > { %314 = vadd.xlane.f32.xlu0 %v313_v42  ;;  %317 = vadd.xlane.f32.xlu1 %v316_v43 }
  0x66   : > { %320 = vadd.xlane.f32.xlu0 %v319_v46  ;;  %323 = vadd.xlane.f32.xlu1 %v322_v47 }
  0x6a   : > { %326 = vadd.xlane.f32.xlu0 %v325_v50  ;;  %329 = vadd.xlane.f32.xlu1 %v328_v51 }
  0x6e   : > { %332 = vadd.xlane.f32.xlu0 %v331_v54  ;;  %335 = vadd.xlane.f32.xlu1 %v334_v55 }
  0x72   : > { %338 = vadd.xlane.f32.xlu0 %v337_v58  ;;  %341 = vadd.xlane.f32.xlu1 %v340_v59 }
  0x76   : > { %344 = vadd.xlane.f32.xlu0 %v343_v62  ;;  %347 = vadd.xlane.f32.xlu1 %v346_v63 }
  0xc3   : > { %v255_v4 = vpop.xlane.xlu0 %254  ;;  %v261_v6 = vpop.xlane.xlu1 %260 }
  0xc4   : > { %v350_v7 = vmul.f32 0.03125, %v255_v4  ;;  %v352_v10 = vmul.f32 0.03125, %v261_v6 }
  0xc6   : > { %v2722_v11 = vsub.f32 %v2490_v0, %v350_v7  ;;  %v2725_v14 = vsub.f32 %v2493_v1, %v352_v10 }
  0xc7   : > { %v258_v15 = vpop.xlane.xlu0 %257  ;;  %v264_v18 = vpop.xlane.xlu1 %263 }
  0xc8   : > { %v351_v19 = vmul.f32 0.03125, %v258_v15  ;;  %v353_v22 = vmul.f32 0.03125, %v264_v18  ;;  %v414_v23 = vmul.f32 %v2722_v11, %v2722_v11  ;;  %v416_v26 = vmul.f32 %v2725_v14, %v2725_v14 }
  0xca   : > { %v2732_v27 = vsub.f32 %v2496_v2, %v351_v19  ;;  %v2735_v30 = vsub.f32 %v2503_v5, %v353_v22  ;;  %v446_v0 = vsel %vm252_vm0, %v414_v23, 0.0  ;;  %v452_v34 = vsel %vm252_vm0, %v416_v26, 0.0 }
  0xcb   : > { %447 = vadd.xlane.f32.xlu0 %v446_v0  ;;  %v267_v1 = vpop.xlane.xlu0 %266  ;;  %v270_v31 = vpop.xlane.xlu1 %269 }
  0xcc   : > { %v354_v35 = vmul.f32 0.03125, %v267_v1  ;;  %v355_v38 = vmul.f32 0.03125, %v270_v31  ;;  %v415_v39 = vmul.f32 %v2732_v27, %v2732_v27  ;;  %v417_v42 = vmul.f32 %v2735_v30, %v2735_v30 }
  0xce   : > { %v2744_v2 = vsub.f32 %v2510_v8, %v354_v35  ;;  %v2747_v5 = vsub.f32 %v2513_v9, %v355_v38  ;;  %v449_v43 = vsel %vm252_vm0, %v415_v39, 0.0  ;;  %v455_v50 = vsel %vm252_vm0, %v417_v42, 0.0 }
  0xcf   : > { %453 = vadd.xlane.f32.xlu0 %v452_v34  ;;  %450 = vadd.xlane.f32.xlu1 %v449_v43  ;;  %v273_v46 = vpop.xlane.xlu0 %272  ;;  %v276_v47 = vpop.xlane.xlu1 %275 }
  0xd0   : > { %v356_v51 = vmul.f32 0.03125, %v273_v46  ;;  %v357_v54 = vmul.f32 0.03125, %v276_v47  ;;  %v418_v55 = vmul.f32 %v2744_v2, %v2744_v2  ;;  %v419_v8 = vmul.f32 %v2747_v5, %v2747_v5 }
  0xd2   : > { %v2756_v58 = vsub.f32 %v2520_v12, %v356_v51  ;;  %v2759_v9 = vsub.f32 %v2523_v13, %v357_v54  ;;  %v458_v59 = vsel %vm252_vm0, %v418_v55, 0.0  ;;  %v461_v4 = vsel %vm252_vm0, %v419_v8, 0.0 }
  0xd3   : > { %456 = vadd.xlane.f32.xlu1 %v455_v50  ;;  %459 = vadd.xlane.f32.xlu0 %v458_v59  ;;  %v279_v62 = vpop.xlane.xlu0 %278  ;;  %v282_v63 = vpop.xlane.xlu1 %281 }
  0xd4   : > { %v358_v6 = vmul.f32 0.03125, %v279_v62  ;;  %v359_v7 = vmul.f32 0.03125, %v282_v63  ;;  %v420_v10 = vmul.f32 %v2756_v58, %v2756_v58  ;;  %v421_v12 = vmul.f32 %v2759_v9, %v2759_v9 }
  0xd6   : > { %v2768_v15 = vsub.f32 %v2530_v16, %v358_v6  ;;  %v2771_v13 = vsub.f32 %v2533_v17, %v359_v7  ;;  %v464_v18 = vsel %vm252_vm0, %v420_v10, 0.0  ;;  %v467_v23 = vsel %vm252_vm0, %v421_v12, 0.0 }
  0xd7   : > { %462 = vadd.xlane.f32.xlu1 %v461_v4  ;;  %465 = vadd.xlane.f32.xlu0 %v464_v18  ;;  %v285_v19 = vpop.xlane.xlu0 %284  ;;  %v288_v22 = vpop.xlane.xlu1 %287 }
  0xd8   : > { %v360_v26 = vmul.f32 0.03125, %v285_v19  ;;  %v361_v0 = vmul.f32 0.03125, %v288_v22  ;;  %v422_v1 = vmul.f32 %v2768_v15, %v2768_v15  ;;  %v423_v16 = vmul.f32 %v2771_v13, %v2771_v13 }
  0xda   : > { %v2780_v31 = vsub.f32 %v2540_v20, %v360_v26  ;;  %v2783_v17 = vsub.f32 %v2543_v21, %v361_v0  ;;  %v470_v34 = vsel %vm252_vm0, %v422_v1, 0.0  ;;  %v473_v39 = vsel %vm252_vm0, %v423_v16, 0.0 }
  0xdb   : > { %468 = vadd.xlane.f32.xlu1 %v467_v23  ;;  %471 = vadd.xlane.f32.xlu0 %v470_v34  ;;  %v291_v35 = vpop.xlane.xlu0 %290  ;;  %v294_v38 = vpop.xlane.xlu1 %293 }
  0xdc   : > { %v362_v42 = vmul.f32 0.03125, %v291_v35  ;;  %v363_v43 = vmul.f32 0.03125, %v294_v38  ;;  %v424_v46 = vmul.f32 %v2780_v31, %v2780_v31  ;;  %v425_v20 = vmul.f32 %v2783_v17, %v2783_v17 }
  0xde   : > { %v2792_v47 = vsub.f32 %v2550_v24, %v362_v42  ;;  %v2795_v21 = vsub.f32 %v2553_v25, %v363_v43  ;;  %v476_v50 = vsel %vm252_vm0, %v424_v46, 0.0  ;;  %v479_v55 = vsel %vm252_vm0, %v425_v20, 0.0 }
  0xdf   : > { %474 = vadd.xlane.f32.xlu1 %v473_v39  ;;  %477 = vadd.xlane.f32.xlu0 %v476_v50  ;;  %v297_v51 = vpop.xlane.xlu0 %296  ;;  %v300_v54 = vpop.xlane.xlu1 %299 }
  0xe0   : > { %v364_v8 = vmul.f32 0.03125, %v297_v51  ;;  %v365_v59 = vmul.f32 0.03125, %v300_v54  ;;  %v426_v62 = vmul.f32 %v2792_v47, %v2792_v47  ;;  %v427_v24 = vmul.f32 %v2795_v21, %v2795_v21 }
  0xe2   : > { %v2804_v63 = vsub.f32 %v2560_v28, %v364_v8  ;;  %v2807_v25 = vsub.f32 %v2563_v29, %v365_v59  ;;  %v482_v4 = vsel %vm252_vm0, %v426_v62, 0.0  ;;  %v485_v10 = vsel %vm252_vm0, %v427_v24, 0.0 }
  0xe3   : > { %480 = vadd.xlane.f32.xlu1 %v479_v55  ;;  %483 = vadd.xlane.f32.xlu0 %v482_v4  ;;  %v303_v6 = vpop.xlane.xlu0 %302  ;;  %v306_v7 = vpop.xlane.xlu1 %305 }
  0xe4   : > { %v366_v12 = vmul.f32 0.03125, %v303_v6  ;;  %v367_v18 = vmul.f32 0.03125, %v306_v7  ;;  %v428_v19 = vmul.f32 %v2804_v63, %v2804_v63  ;;  %v429_v28 = vmul.f32 %v2807_v25, %v2807_v25 }
  0xe6   : > { %v2816_v22 = vsub.f32 %v2570_v32, %v366_v12  ;;  %v2819_v29 = vsub.f32 %v2573_v33, %v367_v18  ;;  %v488_v23 = vsel %vm252_vm0, %v428_v19, 0.0  ;;  %v491_v1 = vsel %vm252_vm0, %v429_v28, 0.0 }
  0xe7   : > { %486 = vadd.xlane.f32.xlu1 %v485_v10  ;;  %489 = vadd.xlane.f32.xlu0 %v488_v23  ;;  %v309_v26 = vpop.xlane.xlu0 %308  ;;  %v312_v0 = vpop.xlane.xlu1 %311 }
  0xe8   : > { %v368_v16 = vmul.f32 0.03125, %v309_v26  ;;  %v369_v34 = vmul.f32 0.03125, %v312_v0  ;;  %v430_v35 = vmul.f32 %v2816_v22, %v2816_v22  ;;  %v431_v32 = vmul.f32 %v2819_v29, %v2819_v29 }
  0xea   : > { %v2828_v38 = vsub.f32 %v2580_v36, %v368_v16  ;;  %v2831_v33 = vsub.f32 %v2583_v37, %v369_v34  ;;  %v494_v39 = vsel %vm252_vm0, %v430_v35, 0.0  ;;  %v497_v46 = vsel %vm252_vm0, %v431_v32, 0.0 }
  0xeb   : > { %492 = vadd.xlane.f32.xlu1 %v491_v1  ;;  %495 = vadd.xlane.f32.xlu0 %v494_v39  ;;  %v315_v42 = vpop.xlane.xlu0 %314  ;;  %v318_v43 = vpop.xlane.xlu1 %317 }
  0xec   : > { %v370_v20 = vmul.f32 0.03125, %v315_v42  ;;  %v371_v50 = vmul.f32 0.03125, %v318_v43  ;;  %v432_v51 = vmul.f32 %v2828_v38, %v2828_v38  ;;  %v433_v36 = vmul.f32 %v2831_v33, %v2831_v33 }
  0xee   : > { %v2840_v37 = vsub.f32 %v2590_v40, %v370_v20  ;;  %v2843_v54 = vsub.f32 %v2593_v41, %v371_v50  ;;  %v500_v55 = vsel %vm252_vm0, %v432_v51, 0.0  ;;  %v503_v8 = vsel %vm252_vm0, %v433_v36, 0.0 }
  0xef   : > { %498 = vadd.xlane.f32.xlu1 %v497_v46  ;;  %501 = vadd.xlane.f32.xlu0 %v500_v55  ;;  %v321_v40 = vpop.xlane.xlu0 %320  ;;  %v324_v41 = vpop.xlane.xlu1 %323 }
  0xf0   : > { %v372_v59 = vmul.f32 0.03125, %v321_v40  ;;  %v373_v62 = vmul.f32 0.03125, %v324_v41  ;;  %v434_v24 = vmul.f32 %v2840_v37, %v2840_v37  ;;  %v435_v4 = vmul.f32 %v2843_v54, %v2843_v54 }
  0xf2   : > { %v2888_v6 = vsub.f32 %v2600_v44, %v372_v59  ;;  %v2891_v7 = vsub.f32 %v2603_v45, %v373_v62  ;;  %v506_v3 = vsel %vm252_vm0, %v434_v24, 0.0  ;;  %v509_v18 = vsel %vm252_vm0, %v435_v4, 0.0 }
  0xf3   : > { %504 = vadd.xlane.f32.xlu1 %v503_v8  ;;  %507 = vadd.xlane.f32.xlu0 %v506_v3  ;;  %v327_v10 = vpop.xlane.xlu0 %326  ;;  %v330_v12 = vpop.xlane.xlu1 %329 }
  0xf4   : > { %v374_v19 = vmul.f32 0.03125, %v327_v10  ;;  %v375_v28 = vmul.f32 0.03125, %v330_v12  ;;  %v436_v23 = vmul.f32 %v2888_v6, %v2888_v6  ;;  %v437_v44 = vmul.f32 %v2891_v7, %v2891_v7 }
  0xf6   : > { %v2900_v26 = vsub.f32 %v2610_v48, %v374_v19  ;;  %v2903_v45 = vsub.f32 %v2613_v49, %v375_v28  ;;  %v512_v0 = vsel %vm252_vm0, %v436_v23, 0.0  ;;  %v515_v34 = vsel %vm252_vm0, %v437_v44, 0.0 }
  0xf7   : > { %510 = vadd.xlane.f32.xlu1 %v509_v18  ;;  %513 = vadd.xlane.f32.xlu0 %v512_v0  ;;  %v333_v1 = vpop.xlane.xlu0 %332  ;;  %v336_v16 = vpop.xlane.xlu1 %335 }
  0xf8   : > { %v376_v35 = vmul.f32 0.03125, %v333_v1  ;;  %v377_v32 = vmul.f32 0.03125, %v336_v16  ;;  %v438_v39 = vmul.f32 %v2900_v26, %v2900_v26  ;;  %v439_v48 = vmul.f32 %v2903_v45, %v2903_v45 }
  0xfa   : > { %v2912_v42 = vsub.f32 %v2620_v52, %v376_v35  ;;  %v2915_v49 = vsub.f32 %v2623_v53, %v377_v32  ;;  %v518_v43 = vsel %vm252_vm0, %v438_v39, 0.0  ;;  %v521_v50 = vsel %vm252_vm0, %v439_v48, 0.0 }
  0xfb   : > { %516 = vadd.xlane.f32.xlu1 %v515_v34  ;;  %519 = vadd.xlane.f32.xlu0 %v518_v43  ;;  %v339_v46 = vpop.xlane.xlu0 %338  ;;  %v342_v20 = vpop.xlane.xlu1 %341 }
  0xfc   : > { %v378_v51 = vmul.f32 0.03125, %v339_v46  ;;  %v379_v36 = vmul.f32 0.03125, %v342_v20  ;;  %v440_v55 = vmul.f32 %v2912_v42, %v2912_v42  ;;  %v441_v52 = vmul.f32 %v2915_v49, %v2915_v49 }
  0xfe   : > { %v2924_v40 = vsub.f32 %v2630_v56, %v378_v51  ;;  %v2927_v53 = vsub.f32 %v2633_v57, %v379_v36  ;;  %v524_v41 = vsel %vm252_vm0, %v440_v55, 0.0  ;;  %v527_v62 = vsel %vm252_vm0, %v441_v52, 0.0 }
  0xff   : > { %522 = vadd.xlane.f32.xlu1 %v521_v50  ;;  %525 = vadd.xlane.f32.xlu0 %v524_v41  ;;  %v345_v8 = vpop.xlane.xlu0 %344  ;;  %v348_v59 = vpop.xlane.xlu1 %347 }
 0x100   : > { %v380_v24 = vmul.f32 0.03125, %v345_v8  ;;  %v381_v4 = vmul.f32 0.03125, %v348_v59  ;;  %v442_v3 = vmul.f32 %v2924_v40, %v2924_v40  ;;  %v443_v56 = vmul.f32 %v2927_v53, %v2927_v53 }
 0x102   : > { %v2936_v10 = vsub.f32 %v2640_v60, %v380_v24  ;;  %v2939_v57 = vsub.f32 %v2643_v61, %v381_v4  ;;  %v530_v12 = vsel %vm252_vm0, %v442_v3, 0.0  ;;  %v533_v18 = vsel %vm252_vm0, %v443_v56, 0.0  ;;  %v2952_v24 = vld [vmem:[%s4124_s1] ss:$0 sm:$0xff]  ;;  %v2958_v3 = vld [vmem:[%s4124_s1 + $0x1] ss:$0 sm:$0xff] }
 0x103   : > { %528 = vadd.xlane.f32.xlu1 %v527_v62  ;;  %531 = vadd.xlane.f32.xlu0 %v530_v12 }
 0x104   : > { %v444_v19 = vmul.f32 %v2936_v10, %v2936_v10  ;;  %v445_v28 = vmul.f32 %v2939_v57, %v2939_v57 }
 0x106   : > { %v536_v23 = vsel %vm252_vm0, %v444_v19, 0.0  ;;  %v539_v60 = vsel %vm252_vm0, %v445_v28, 0.0 }
 0x107   : > { %534 = vadd.xlane.f32.xlu1 %v533_v18  ;;  %537 = vadd.xlane.f32.xlu0 %v536_v23 }
 0x10b   : > { %540 = vadd.xlane.f32.xlu1 %v539_v60 }
 0x154   : > { %v448_v61 = vpop.xlane.xlu0 %447 }
 0x155   : > { %v542_v44 = vmul.f32 0.03125, %v448_v61 }
 0x157   : > { %v574_v0 = vadd.f32 1e-05, %v542_v44 }
 0x158   : > { %v451_v1 = vpop.xlane.xlu1 %450  ;;  %v454_v16 = vpop.xlane.xlu0 %453 }
 0x159   : > { %2145 = vrsqrt.f32 %v574_v0  ;;  %v543_v34 = vmul.f32 0.03125, %v451_v1  ;;  %v544_v35 = vmul.f32 0.03125, %v454_v16 }
 0x15b   : > { %v575_v32 = vadd.f32 1e-05, %v543_v34  ;;  %v576_v39 = vadd.f32 1e-05, %v544_v35 }
 0x15c   : > { %v457_v48 = vpop.xlane.xlu1 %456  ;;  %v460_v43 = vpop.xlane.xlu0 %459 }
 0x15d   : > { %2147 = vrsqrt.f32 %v575_v32  ;;  %v545_v46 = vmul.f32 0.03125, %v457_v48  ;;  %v546_v20 = vmul.f32 0.03125, %v460_v43 }
 0x15e   : > { %2149 = vrsqrt.f32 %v576_v39 }
 0x15f   : > { %v577_v50 = vadd.f32 1e-05, %v545_v46  ;;  %v578_v51 = vadd.f32 1e-05, %v546_v20 }
 0x160   : > { %v463_v36 = vpop.xlane.xlu1 %462  ;;  %v466_v55 = vpop.xlane.xlu0 %465 }
 0x161   : > { %2151 = vrsqrt.f32 %v577_v50  ;;  %v547_v52 = vmul.f32 0.03125, %v463_v36  ;;  %v548_v41 = vmul.f32 0.03125, %v466_v55 }
 0x162   : > { %2153 = vrsqrt.f32 %v578_v51 }
 0x163   : > { %v579_v8 = vadd.f32 1e-05, %v547_v52  ;;  %v580_v59 = vadd.f32 1e-05, %v548_v41 }
 0x164   : > { %v469_v60 = vpop.xlane.xlu1 %468  ;;  %v472_v0 = vpop.xlane.xlu0 %471 }
 0x165   : > { %2155 = vrsqrt.f32 %v579_v8  ;;  %v549_v51 = vmul.f32 0.03125, %v469_v60  ;;  %v550_v52 = vmul.f32 0.03125, %v472_v0 }
 0x166   : > { %v2146_v62 = vpop.eup %2145  ;;  %2157 = vrsqrt.f32 %v580_v59 }
 0x167   : > { %v638_v4 = vmul.f32 %v2146_v62, %v2722_v11  ;;  %v582_v59 = vadd.f32 1e-05, %v550_v52 }
 0x168   : > { %v475_v46 = vpop.xlane.xlu1 %474  ;;  %v478_v50 = vpop.xlane.xlu0 %477 }
 0x169   : > { %v674_v56 = vmul.f32 %v2952_v24, %v638_v4  ;;  %v551_v62 = vmul.f32 0.03125, %v475_v46 }
 0x16a   : > { %v2148_v12 = vpop.eup %2147 }
 0x16b   : > { %v2150_v18 = vpop.eup %2149  ;;  %v2962_v19 = vadd.f32 %v2958_v3, %v674_v56  ;;  %v639_v28 = vmul.f32 %v2148_v12, %v2732_v27  ;;  %v552_v56 = vmul.f32 0.03125, %v478_v50 }
 0x16c   : > { %v640_v23 = vmul.f32 %v2150_v18, %v2725_v14  ;;  %v481_v8 = vpop.xlane.xlu1 %480  ;;  %v484_v4 = vpop.xlane.xlu0 %483 }
 0x16d   : > { %897 = vst.msk [vmem:[#allocation2 + $0x19] sm:$0xff] %vm252_vm0, %v2962_v19  ;;  %v675_v11 = vmul.f32 %v2952_v24, %v639_v28  ;;  %v553_v12 = vmul.f32 0.03125, %v481_v8  ;;  %v554_v18 = vmul.f32 0.03125, %v484_v4  ;;  %v583_v28 = vadd.f32 1e-05, %v551_v62 }
 0x16e   : > { %v2152_v61 = vpop.eup %2151  ;;  %v676_v44 = vmul.f32 %v2952_v24, %v640_v23  ;;  %v584_v23 = vadd.f32 1e-05, %v552_v56 }
 0x16f   : > { %v2154_v1 = vpop.eup %2153  ;;  %v2971_v16 = vadd.f32 %v2958_v3, %v675_v11  ;;  %v641_v34 = vmul.f32 %v2152_v61, %v2735_v30  ;;  %v585_v11 = vadd.f32 1e-05, %v553_v12  ;;  %v586_v60 = vadd.f32 1e-05, %v554_v18 }
 0x170   : > { %v2975_v27 = vadd.f32 %v2958_v3, %v676_v44  ;;  %v642_v14 = vmul.f32 %v2154_v1, %v2744_v2  ;;  %v490_v8 = vpop.xlane.xlu0 %489 }
 0x171   : > { %898 = vst.msk [vmem:[#allocation2 + $0x21] sm:$0xff] %vm252_vm0, %v2971_v16  ;;  %v677_v35 = vmul.f32 %v2952_v24, %v641_v34  ;;  %v556_v4 = vmul.f32 0.03125, %v490_v8 }
 0x172   : > { %4166 = vst [vmem:[#allocation9_spill] sm:$0xff] %v2975_v27  ;;  %v2156_v32 = vpop.eup %2155  ;;  %899 = vst.msk [vmem:[#allocation2 + $0x31] sm:$0xff] %vm252_vm0, %v2975_v27  ;;  %v678_v39 = vmul.f32 %v2952_v24, %v642_v14 }
 0x173   : > { %v2158_v48 = vpop.eup %2157  ;;  %v2985_v43 = vadd.f32 %v2958_v3, %v677_v35  ;;  %v643_v30 = vmul.f32 %v2156_v32, %v2747_v5  ;;  %v588_v18 = vadd.f32 1e-05, %v556_v4 }
 0x174   : > { %v2989_v2 = vadd.f32 %v2958_v3, %v678_v39  ;;  %v644_v20 = vmul.f32 %v2158_v48, %v2756_v58  ;;  %v581_v58 = vadd.f32 1e-05, %v549_v51 }
 0x175   : > { %4167 = vst [vmem:[#allocation10_spill] sm:$0xff] %v2985_v43  ;;  %900 = vst.msk [vmem:[#allocation2 + $0x39] sm:$0xff] %vm252_vm0, %v2985_v43  ;;  %v679_v36 = vmul.f32 %v2952_v24, %v643_v30 }
 0x176   : > { %4168 = vst [vmem:[#allocation11_spill] sm:$0xff] %v2989_v2  ;;  %901 = vst.msk [vmem:[#allocation2 + $0x49] sm:$0xff] %vm252_vm0, %v2989_v2  ;;  %v680_v55 = vmul.f32 %v2952_v24, %v644_v20  ;;  %2159 = vrsqrt.f32 %v581_v58 }
 0x177   : > { %v2999_v5 = vadd.f32 %v2958_v3, %v679_v36  ;;  %2161 = vrsqrt.f32 %v582_v59 }
 0x178   : > { %v3002_v41 = vadd.f32 %v2958_v3, %v680_v55  ;;  %2163 = vrsqrt.f32 %v583_v28 }
 0x179   : > { %4169 = vst [vmem:[#allocation12_spill] sm:$0xff] %v2999_v5  ;;  %902 = vst.msk [vmem:[#allocation2 + $0x51] sm:$0xff] %vm252_vm0, %v2999_v5  ;;  %2165 = vrsqrt.f32 %v584_v23  ;;  %v496_v23 = vpop.xlane.xlu0 %495 }
 0x17a   : > { %4170 = vst [vmem:[#allocation13_spill] sm:$0xff] %v3002_v41  ;;  %903 = vst.msk [vmem:[#allocation2 + $0x61] sm:$0xff] %vm252_vm0, %v3002_v41  ;;  %2167 = vrsqrt.f32 %v585_v11 }
 0x17b   : > { %2169 = vrsqrt.f32 %v586_v60 }
 0x17d   : > { %v502_v60 = vpop.xlane.xlu0 %501 }
 0x183   : > { %v2160_v61 = vpop.eup %2159 }
 0x184   : > { %v2162_v44 = vpop.eup %2161  ;;  %v645_v0 = vmul.f32 %v2160_v61, %v2759_v9 }
 0x185   : > { %v646_v1 = vmul.f32 %v2162_v44, %v2768_v15  ;;  %v2164_v34 = vpop.eup %2163 }
 0x186   : > { %v2166_v14 = vpop.eup %2165  ;;  %v681_v39 = vmul.f32 %v2952_v24, %v645_v0  ;;  %v647_v30 = vmul.f32 %v2164_v34, %v2771_v13  ;;  %v508_v0 = vpop.xlane.xlu0 %507 }
 0x187   : > { %v2168_v35 = vpop.eup %2167  ;;  %v682_v48 = vmul.f32 %v2952_v24, %v646_v1  ;;  %v648_v46 = vmul.f32 %v2166_v14, %v2780_v31 }
 0x188   : > { %v2170_v32 = vpop.eup %2169  ;;  %v3015_v20 = vadd.f32 %v2958_v3, %v681_v39  ;;  %v649_v9 = vmul.f32 %v2168_v35, %v2783_v17  ;;  %v683_v15 = vmul.f32 %v2952_v24, %v647_v30  ;;  %v558_v39 = vmul.f32 0.03125, %v496_v23 }
 0x189   : > { %v3018_v50 = vadd.f32 %v2958_v3, %v682_v48  ;;  %v684_v51 = vmul.f32 %v2952_v24, %v648_v46  ;;  %v650_v36 = vmul.f32 %v2170_v32, %v2792_v47  ;;  %v487_v47 = vpop.xlane.xlu1 %486 }
 0x18a   : > { %4171 = vst [vmem:[#allocation14_spill] sm:$0xff] %v3015_v20  ;;  %904 = vst.msk [vmem:[#allocation2 + $0x69] sm:$0xff] %vm252_vm0, %v3015_v20  ;;  %v685_v13 = vmul.f32 %v2952_v24, %v649_v9  ;;  %v3030_v31 = vadd.f32 %v2958_v3, %v683_v15  ;;  %v555_v62 = vmul.f32 0.03125, %v487_v47  ;;  %v560_v15 = vmul.f32 0.03125, %v502_v60 }
 0x18b   : > { %4172 = vst [vmem:[#allocation15_spill] sm:$0xff] %v3018_v50  ;;  %905 = vst.msk [vmem:[#allocation2 + $0x79] sm:$0xff] %vm252_vm0, %v3018_v50  ;;  %v3033_v55 = vadd.f32 %v2958_v3, %v684_v51  ;;  %v686_v52 = vmul.f32 %v2952_v24, %v650_v36  ;;  %v514_v51 = vpop.xlane.xlu0 %513  ;;  %v562_v47 = vmul.f32 0.03125, %v508_v0 }
 0x18c   : > { %4173 = vst [vmem:[#allocation16_spill] sm:$0xff] %v3030_v31  ;;  %v3036_v17 = vadd.f32 %v2958_v3, %v685_v13  ;;  %906 = vst.msk [vmem:[#allocation2 + $0x81] sm:$0xff] %vm252_vm0, %v3030_v31  ;;  %v587_v12 = vadd.f32 1e-05, %v555_v62  ;;  %v592_v4 = vadd.f32 1e-05, %v560_v15 }
 0x18d   : > { %4174 = vst [vmem:[#allocation17_spill] sm:$0xff] %v3033_v55  ;;  %907 = vst.msk [vmem:[#allocation2 + $0x91] sm:$0xff] %vm252_vm0, %v3033_v55  ;;  %v3046_v58 = vadd.f32 %v2958_v3, %v686_v52  ;;  %v493_v59 = vpop.xlane.xlu1 %492 }
 0x18e   : > { %4175 = vst [vmem:[#allocation18_spill] sm:$0xff] %v3036_v17  ;;  %908 = vst.msk [vmem:[#allocation2 + $0x99] sm:$0xff] %vm252_vm0, %v3036_v17  ;;  %v557_v56 = vmul.f32 0.03125, %v493_v59  ;;  %2171 = vrsqrt.f32 %v587_v12  ;;  %v564_v12 = vmul.f32 0.03125, %v514_v51 }
 0x18f   : > { %4176 = vst [vmem:[#allocation19_spill] sm:$0xff] %v3046_v58  ;;  %909 = vst.msk [vmem:[#allocation2 + $0xa9] sm:$0xff] %vm252_vm0, %v3046_v58  ;;  %2173 = vrsqrt.f32 %v588_v18  ;;  %v594_v18 = vadd.f32 1e-05, %v562_v47  ;;  %v520_v23 = vpop.xlane.xlu0 %519 }
 0x190   : > { %v589_v28 = vadd.f32 1e-05, %v557_v56  ;;  %v596_v60 = vadd.f32 1e-05, %v564_v12 }
 0x191   : > { %v499_v11 = vpop.xlane.xlu1 %498 }
 0x192   : > { %2175 = vrsqrt.f32 %v589_v28  ;;  %v559_v46 = vmul.f32 0.03125, %v499_v11 }
 0x194   : > { %v591_v8 = vadd.f32 1e-05, %v559_v46 }
 0x195   : > { %v505_v61 = vpop.xlane.xlu1 %504 }
 0x196   : > { %v561_v52 = vmul.f32 0.03125, %v505_v61  ;;  %v566_v61 = vmul.f32 0.03125, %v520_v23 }
 0x198   : > { %v593_v56 = vadd.f32 1e-05, %v561_v52  ;;  %v598_v0 = vadd.f32 1e-05, %v566_v61 }
 0x199   : > { %v511_v35 = vpop.xlane.xlu1 %510 }
 0x19a   : > { %v563_v59 = vmul.f32 0.03125, %v511_v35 }
 0x19b   : > { %v2172_v44 = vpop.eup %2171 }
 0x19c   : > { %v2174_v1 = vpop.eup %2173  ;;  %v651_v14 = vmul.f32 %v2172_v44, %v2795_v21  ;;  %v595_v11 = vadd.f32 1e-05, %v563_v59 }
 0x19d   : > { %v652_v32 = vmul.f32 %v2174_v1, %v2804_v63  ;;  %v590_v63 = vadd.f32 1e-05, %v558_v39  ;;  %v517_v62 = vpop.xlane.xlu1 %516 }
 0x19e   : > { %v687_v48 = vmul.f32 %v2952_v24, %v651_v14  ;;  %v565_v28 = vmul.f32 0.03125, %v517_v62 }
 0x19f   : > { %v2176_v34 = vpop.eup %2175  ;;  %v688_v9 = vmul.f32 %v2952_v24, %v652_v32  ;;  %2177 = vrsqrt.f32 %v590_v63 }
 0x1a0   : > { %v653_v30 = vmul.f32 %v2176_v34, %v2807_v25  ;;  %v3056_v36 = vadd.f32 %v2958_v3, %v687_v48  ;;  %2179 = vrsqrt.f32 %v591_v8  ;;  %v597_v44 = vadd.f32 1e-05, %v565_v28 }
 0x1a1   : > { %v3060_v21 = vadd.f32 %v2958_v3, %v688_v9  ;;  %2181 = vrsqrt.f32 %v592_v4 }
 0x1a2   : > { %4177 = vst [vmem:[#allocation20_spill] sm:$0xff] %v3056_v36  ;;  %v689_v13 = vmul.f32 %v2952_v24, %v653_v30  ;;  %910 = vst.msk [vmem:[#allocation2 + $0xb1] sm:$0xff] %vm252_vm0, %v3056_v36  ;;  %2183 = vrsqrt.f32 %v593_v56 }
 0x1a3   : > { %4178 = vst [vmem:[#allocation21_spill] sm:$0xff] %v3060_v21  ;;  %911 = vst.msk [vmem:[#allocation2 + $0xc1] sm:$0xff] %vm252_vm0, %v3060_v21  ;;  %2185 = vrsqrt.f32 %v594_v18 }
 0x1a4   : > { %v3065_v25 = vadd.f32 %v2958_v3, %v689_v13  ;;  %2187 = vrsqrt.f32 %v595_v11 }
 0x1a5   : > { %2189 = vrsqrt.f32 %v596_v60 }
 0x1a6   : > { %4179 = vst [vmem:[#allocation22_spill] sm:$0xff] %v3065_v25  ;;  %912 = vst.msk [vmem:[#allocation2 + $0xc9] sm:$0xff] %vm252_vm0, %v3065_v25  ;;  %2191 = vrsqrt.f32 %v597_v44  ;;  %v526_v44 = vpop.xlane.xlu0 %525 }
 0x1a7   : > { %2193 = vrsqrt.f32 %v598_v0 }
 0x1ac   : > { %v2178_v1 = vpop.eup %2177 }
 0x1ad   : > { %v2180_v34 = vpop.eup %2179  ;;  %v654_v48 = vmul.f32 %v2178_v1, %v2816_v22 }
 0x1ae   : > { %v2182_v14 = vpop.eup %2181  ;;  %v655_v30 = vmul.f32 %v2180_v34, %v2819_v29  ;;  %v532_v34 = vpop.xlane.xlu0 %531 }
 0x1af   : > { %v2184_v35 = vpop.eup %2183  ;;  %v656_v46 = vmul.f32 %v2182_v14, %v2828_v38  ;;  %v690_v15 = vmul.f32 %v2952_v24, %v654_v48  ;;  %v568_v14 = vmul.f32 0.03125, %v526_v44 }
 0x1b0   : > { %v2186_v32 = vpop.eup %2185  ;;  %v657_v51 = vmul.f32 %v2184_v35, %v2831_v33  ;;  %v691_v63 = vmul.f32 %v2952_v24, %v655_v30 }
 0x1b1   : > { %v2188_v39 = vpop.eup %2187  ;;  %v658_v13 = vmul.f32 %v2186_v32, %v2840_v37  ;;  %v692_v47 = vmul.f32 %v2952_v24, %v656_v46  ;;  %v3081_v22 = vadd.f32 %v2958_v3, %v690_v15  ;;  %v570_v32 = vmul.f32 0.03125, %v532_v34 }
 0x1b2   : > { %v2190_v9 = vpop.eup %2189  ;;  %v659_v8 = vmul.f32 %v2188_v39, %v2843_v54  ;;  %v693_v29 = vmul.f32 %v2952_v24, %v657_v51  ;;  %v3086_v59 = vadd.f32 %v2958_v3, %v691_v63  ;;  %v600_v48 = vadd.f32 1e-05, %v568_v14 }
 0x1b3   : > { %v2192_v52 = vpop.eup %2191  ;;  %4180 = vst [vmem:[#allocation23_spill] sm:$0xff] %v3081_v22  ;;  %v694_v38 = vmul.f32 %v2952_v24, %v658_v13  ;;  %v3089_v33 = vadd.f32 %v2958_v3, %v692_v47  ;;  %v660_v62 = vmul.f32 %v2190_v9, %v2888_v6  ;;  %913 = vst.msk [vmem:[#allocation2 + $0xd9] sm:$0xff] %vm252_vm0, %v3081_v22  ;;  %v602_v46 = vadd.f32 1e-05, %v570_v32 }
 0x1b4   : > { %4181 = vst [vmem:[#allocation24_spill] sm:$0xff] %v3086_v59  ;;  %v695_v37 = vmul.f32 %v2952_v24, %v659_v8  ;;  %v2194_v4 = vpop.eup %2193  ;;  %v3096_v54 = vadd.f32 %v2958_v3, %v693_v29  ;;  %v661_v12 = vmul.f32 %v2192_v52, %v2891_v7  ;;  %914 = vst.msk [vmem:[#allocation2 + $0xe1] sm:$0xff] %vm252_vm0, %v3086_v59  ;;  %v773_v34 = vsel %vm252_vm0, %v2971_v16, 0.0 }
 0x1b5   : > { %4182 = vst [vmem:[#allocation25_spill] sm:$0xff] %v3089_v33  ;;  %v3099_v56 = vadd.f32 %v2958_v3, %v694_v38  ;;  %915 = vst.msk [vmem:[#allocation2 + $0xf1] sm:$0xff] %vm252_vm0, %v3089_v33  ;;  %v696_v18 = vmul.f32 %v2952_v24, %v660_v62  ;;  %v662_v28 = vmul.f32 %v2194_v4, %v2900_v26  ;;  %v523_v26 = vpop.xlane.xlu1 %522  ;;  %v743_v14 = vsel %vm252_vm0, %v2975_v27, 0.0 }
 0x1b6   : > { %4183 = vst [vmem:[#allocation26_spill] sm:$0xff] %v3096_v54  ;;  %v3107_v6 = vadd.f32 %v2958_v3, %v695_v37  ;;  %916 = vst.msk [vmem:[#allocation2 + $0xf9] sm:$0xff] %vm252_vm0, %v3096_v54  ;;  %v697_v7 = vmul.f32 %v2952_v24, %v661_v12  ;;  %v567_v1 = vmul.f32 0.03125, %v523_v26 }
 0x1b7   : > { %4184 = vst [vmem:[#allocation27_spill] sm:$0xff] %v3099_v56  ;;  %917 = vst.msk [vmem:[#allocation2 + $0x109] sm:$0xff] %vm252_vm0, %v3099_v56  ;;  %v3119_v23 = vadd.f32 %v2958_v3, %v696_v18  ;;  %v698_v60 = vmul.f32 %v2952_v24, %v662_v28  ;;  %v538_v18 = vpop.xlane.xlu0 %537 }
 0x1b8   : > { %4185 = vst [vmem:[#allocation28_spill] sm:$0xff] %v3107_v6  ;;  %918 = vst.msk [vmem:[#allocation2 + $0x111] sm:$0xff] %vm252_vm0, %v3107_v6  ;;  %v3122_v11 = vadd.f32 %v2958_v3, %v697_v7  ;;  %v599_v39 = vadd.f32 1e-05, %v567_v1  ;;  %v572_v28 = vmul.f32 0.03125, %v538_v18  ;;  %v753_v18 = vsel %vm252_vm0, %v3046_v58, 0.0 }
 0x1b9   : > { %4186 = vst [vmem:[#allocation29_spill] sm:$0xff] %v3119_v23  ;;  %919 = vst.msk [vmem:[#allocation2 + $0x121] sm:$0xff] %vm252_vm0, %v3119_v23  ;;  %v3130_v61 = vadd.f32 %v2958_v3, %v698_v60  ;;  %v529_v0 = vpop.xlane.xlu1 %528 }
 0x1ba   : > { %4187 = vst [vmem:[#allocation30_spill] sm:$0xff] %v3122_v11  ;;  %920 = vst.msk [vmem:[#allocation2 + $0x129] sm:$0xff] %vm252_vm0, %v3122_v11  ;;  %v569_v35 = vmul.f32 0.03125, %v529_v0  ;;  %2195 = vrsqrt.f32 %v599_v39  ;;  %v604_v44 = vadd.f32 1e-05, %v572_v28  ;;  %v774_v0 = vsel %vm252_vm0, %v2985_v43, 0.0 }
 0x1bb   : > { %4188 = vst [vmem:[#allocation31_spill] sm:$0xff] %v3130_v61  ;;  %921 = vst.msk [vmem:[#allocation2 + $0x139] sm:$0xff] %vm252_vm0, %v3130_v61  ;;  %2197 = vrsqrt.f32 %v600_v48  ;;  %v775_v32 = vadd.f32 %v774_v0, %v773_v34  ;;  %v742_v39 = vsel %vm252_vm0, %v2962_v19, 0.0  ;;  %v745_v48 = vsel %vm252_vm0, %v2989_v2, 0.0 }
 0x1bc   : > { %v601_v30 = vadd.f32 1e-05, %v569_v35  ;;  %v776_v35 = vsel %vm252_vm0, %v2999_v5, 0.0  ;;  %v251_v5 = vld [vmem:[%s4124_s1 + $0x3] sm:$0x1] }
 0x1bd   : > { %v535_v52 = vpop.xlane.xlu1 %534 }
 0x1be   : > { %2199 = vrsqrt.f32 %v601_v30  ;;  %v571_v7 = vmul.f32 0.03125, %v535_v52  ;;  %v778_v30 = vsel %vm252_vm0, %v3015_v20, 0.0  ;;  %v1057_v58 = vld [vmem:[#allocation2 + $0x109] sm:$0xff] }
 0x1bf   : > { %2201 = vrsqrt.f32 %v602_v46  ;;  %v744_v46 = vadd.f32 %v743_v14, %v742_v39  ;;  %v757_v14 = vsel %vm252_vm0, %v3081_v22, 0.0  ;;  %v1056_v22 = vld [vmem:[#allocation2 + $0xf9] sm:$0xff] }
 0x1c0   : > { %v603_v26 = vadd.f32 1e-05, %v571_v7 }
 0x1c2   : > { %2203 = vrsqrt.f32 %v603_v26  ;;  %v788_v26 = vsel %vm252_vm0, %v3086_v59, 0.0 }
 0x1c3   : > { %2205 = vrsqrt.f32 %v604_v44 }
 0x1c7   : > { %v2196_v9 = vpop.eup %2195 }
 0x1c8   : > { %v2198_v15 = vpop.eup %2197  ;;  %v663_v63 = vmul.f32 %v2196_v9, %v2903_v45  ;;  %v777_v9 = vadd.f32 %v776_v35, %v775_v32  ;;  %v790_v35 = vsel %vm252_vm0, %v3096_v54, 0.0 }
 0x1c9   : > { %v664_v47 = vmul.f32 %v2198_v15, %v2912_v42  ;;  %v541_v42 = vpop.xlane.xlu1 %540  ;;  %v747_v15 = vsel %vm252_vm0, %v3002_v41, 0.0 }
 0x1ca   : > { %v699_v8 = vmul.f32 %v2952_v24, %v663_v63  ;;  %v573_v60 = vmul.f32 0.03125, %v541_v42  ;;  %v779_v52 = vadd.f32 %v778_v30, %v777_v9  ;;  %v749_v63 = vsel %vm252_vm0, %v3018_v50, 0.0 }
 0x1cb   : > { %v2200_v51 = vpop.eup %2199  ;;  %v700_v37 = vmul.f32 %v2952_v24, %v664_v47  ;;  %v782_v47 = vsel %vm252_vm0, %v3036_v17, 0.0  ;;  %v786_v42 = vsel %vm252_vm0, %v3065_v25, 0.0  ;;  %v759_v30 = vsel %vm252_vm0, %v3089_v33, 0.0 }
 0x1cc   : > { %v2202_v13 = vpop.eup %2201  ;;  %v665_v29 = vmul.f32 %v2200_v51, %v2915_v49  ;;  %v3141_v62 = vadd.f32 %v2958_v3, %v699_v8  ;;  %v605_v1 = vadd.f32 1e-05, %v573_v60  ;;  %v780_v51 = vsel %vm252_vm0, %v3030_v31, 0.0 }
 0x1cd   : > { %v666_v38 = vmul.f32 %v2202_v13, %v2924_v40  ;;  %v3146_v45 = vadd.f32 %v2958_v3, %v700_v37  ;;  %v746_v13 = vadd.f32 %v745_v48, %v744_v46  ;;  %v784_v37 = vsel %vm252_vm0, %v3056_v36, 0.0 }
 0x1ce   : > { %4189 = vst [vmem:[#allocation32_spill] sm:$0xff] %v3141_v62  ;;  %v701_v4 = vmul.f32 %v2952_v24, %v665_v29  ;;  %922 = vst.msk [vmem:[#allocation2 + $0x141] sm:$0xff] %vm252_vm0, %v3141_v62  ;;  %2207 = vrsqrt.f32 %v605_v1  ;;  %v781_v29 = vadd.f32 %v780_v51, %v779_v52  ;;  %v755_v60 = vsel %vm252_vm0, %v3060_v21, 0.0 }
 0x1cf   : > { %v702_v12 = vmul.f32 %v2952_v24, %v666_v38  ;;  %4190 = vst [vmem:[#allocation33_spill] sm:$0xff] %v3146_v45  ;;  %923 = vst.msk [vmem:[#allocation2 + $0x151] sm:$0xff] %vm252_vm0, %v3146_v45  ;;  %v748_v8 = vadd.f32 %v747_v15, %v746_v13  ;;  %v751_v38 = vsel %vm252_vm0, %v3033_v55, 0.0  ;;  %v2204_v44 = vpop.eup %2203  ;;  %v792_v46 = vsel %vm252_vm0, %v3107_v6, 0.0 }
 0x1d0   : > { %v3151_v49 = vadd.f32 %v2958_v3, %v701_v4  ;;  %v2206_v34 = vpop.eup %2205  ;;  %v667_v9 = vmul.f32 %v2204_v44, %v2927_v53  ;;  %v761_v52 = vsel %vm252_vm0, %v3099_v56, 0.0  ;;  %v767_v44 = vsel %vm252_vm0, %v3146_v45, 0.0  ;;  %v1042_v56 = vld [vmem:[#allocation2 + $0x51] sm:$0xff] }
 0x1d1   : > { %v3154_v40 = vadd.f32 %v2958_v3, %v702_v12  ;;  %v750_v4 = vadd.f32 %v749_v63, %v748_v8  ;;  %v783_v12 = vadd.f32 %v782_v47, %v781_v29  ;;  %v668_v13 = vmul.f32 %v2206_v34, %v2936_v10 }
 0x1d2   : > { %4191 = vst [vmem:[#allocation34_spill] sm:$0xff] %v3151_v49  ;;  %924 = vst.msk [vmem:[#allocation2 + $0x159] sm:$0xff] %vm252_vm0, %v3151_v49  ;;  %v703_v63 = vmul.f32 %v2952_v24, %v667_v9  ;;  %v794_v8 = vsel %vm252_vm0, %v3122_v11, 0.0  ;;  %v763_v10 = vsel %vm252_vm0, %v3119_v23, 0.0  ;;  %v3341_v11 = vld [vmem:[%s4124_s1 + $0xc] ss:$0 sm:$0xff] }
 0x1d3   : > { %4192 = vst [vmem:[#allocation35_spill] sm:$0xff] %v3154_v40  ;;  %925 = vst.msk [vmem:[#allocation2 + $0x169] sm:$0xff] %vm252_vm0, %v3154_v40  ;;  %v752_v7 = vadd.f32 %v751_v38, %v750_v4  ;;  %v785_v28 = vadd.f32 %v784_v37, %v783_v12  ;;  %v704_v38 = vmul.f32 %v2952_v24, %v668_v13  ;;  %v796_v12 = vsel %vm252_vm0, %v3141_v62, 0.0 }
 0x1d4   : > { %v3214_v53 = vadd.f32 %v2958_v3, %v703_v63  ;;  %v769_v34 = vsel %vm252_vm0, %v3154_v40, 0.0 }
 0x1d5   : > { %v754_v0 = vadd.f32 %v753_v18, %v752_v7  ;;  %v787_v1 = vadd.f32 %v786_v42, %v785_v28  ;;  %v798_v28 = vsel %vm252_vm0, %v3151_v49, 0.0 }
 0x1d6   : > { %4193 = vst [vmem:[#allocation36_spill] sm:$0xff] %v3214_v53  ;;  %926 = vst.msk [vmem:[#allocation2 + $0x171] sm:$0xff] %vm252_vm0, %v3214_v53 }
 0x1d7   : > { %v756_v39 = vadd.f32 %v755_v60, %v754_v0  ;;  %v789_v48 = vadd.f32 %v788_v26, %v787_v1 }
 0x1d9   : > { %v758_v15 = vadd.f32 %v757_v14, %v756_v39  ;;  %v791_v51 = vadd.f32 %v790_v35, %v789_v48 }
 0x1db   : > { %v2208_v32 = vpop.eup %2207  ;;  %v760_v29 = vadd.f32 %v759_v30, %v758_v15  ;;  %v793_v37 = vadd.f32 %v792_v46, %v791_v51 }
 0x1dc   : > { %v669_v47 = vmul.f32 %v2208_v32, %v2939_v57  ;;  %v3222_v57 = vadd.f32 %v2958_v3, %v704_v38 }
 0x1dd   : > { %v762_v18 = vadd.f32 %v761_v52, %v760_v29  ;;  %v795_v42 = vadd.f32 %v794_v8, %v793_v37 }
 0x1de   : > { %v705_v4 = vmul.f32 %v2952_v24, %v669_v47  ;;  %4194 = vst [vmem:[#allocation37_spill] sm:$0xff] %v3222_v57  ;;  %v765_v24 = vsel %vm252_vm0, %v3130_v61, 0.0  ;;  %927 = vst.msk [vmem:[#allocation2 + $0x181] sm:$0xff] %vm252_vm0, %v3222_v57  ;;  %v771_v39 = vsel %vm252_vm0, %v3222_v57, 0.0  ;;  %v1041_v61 = vld [vmem:[#allocation2 + $0x49] sm:$0xff] }
 0x1df   : > { %v764_v60 = vadd.f32 %v763_v10, %v762_v18  ;;  %v797_v26 = vadd.f32 %v796_v12, %v795_v42  ;;  %v2351_v42 = vmov 0  }
 0x1e0   : > { %v3227_v7 = vadd.f32 %v2958_v3, %v705_v4  ;;  %v800_v3 = vsel %vm252_vm0, %v3214_v53, 0.0  ;;  %v817_v4 = vld [vmem:[%s4125_s2] sm:$0x3]  ;;  %2143 = vset.pattern.permute.xlu1 %v2351_v42  ;;  %2144 = vset.pattern.permute.xlu0 %v2351_v42 }
 0x1e1   : > { %v766_v0 = vadd.f32 %v765_v24, %v764_v60  ;;  %v799_v1 = vadd.f32 %v798_v28, %v797_v26  ;;  %v934_v24 = vld [vmem:[#allocation2] sm:$0xff] }
 0x1e2   : > { %4195 = vst [vmem:[#allocation38_spill] sm:$0xff] %v3227_v7  ;;  %928 = vst.msk [vmem:[#allocation2 + $0x189] sm:$0xff] %vm252_vm0, %v3227_v7  ;;  %v802_v14 = vsel %vm252_vm0, %v3227_v7, 0.0  ;;  %v3256_v28 = vld [vmem:[%s4124_s1 + $0x4] ss:$0 sm:$0xff] }
 0x1e3   : > { %v768_v35 = vadd.f32 %v767_v44, %v766_v0  ;;  %v801_v32 = vadd.f32 %v800_v3, %v799_v1  ;;  %v971_v60 = vmul.f32 %v3256_v28, %v934_v24  ;;  %v824_v26 = vld [vmem:[%s4126_s3] sm:$0x3]  ;;  %v3265_v44 = vld [vmem:[%s4124_s1 + $0x2] ss:$0 sm:$0xff]  ;;  %v3270_v0 = vld [vmem:[%s4124_s1 + $0x5] ss:$0 sm:$0xff] }
 0x1e4   : > { %v1035_v3 = vld [vmem:[#allocation2 + $0x1] sm:$0xff]  ;;  %v1079_v54 = vmul.f32 %v3270_v0, %v1042_v56 }
 0x1e5   : > { %v770_v48 = vadd.f32 %v769_v34, %v768_v35  ;;  %v803_v30 = vadd.f32 %v802_v14, %v801_v32  ;;  %v935_v34 = vld [vmem:[#allocation2 + $0x8] sm:$0xff]  ;;  %v1003_v35 = vadd.f32 %v3265_v44, %v971_v60  ;;  %v1072_v32 = vmul.f32 %v3270_v0, %v1035_v3  ;;  %v1138_v60 = vld [vmem:[#allocation2 + $0x1a] sm:$0xff] }
 0x1e6   : > { %v3296_v3 = vld [vmem:[%s4124_s1 + $0x8] ss:$0 sm:$0xff]  ;;  %v3738_v50 = vld [vmem:[#allocation2 + $0x180] sm:$0xff] }
 0x1e7   : > { %v772_v46 = vadd.f32 %v771_v39, %v770_v48  ;;  %v806_v9 = vmul.f32 0.0625, %v803_v30  ;;  %v1136_v39 = vld [vmem:[#allocation2 + $0x2] sm:$0xff]  ;;  %v1379_v6 = vmul.f32 %v3296_v3, %v1041_v61 }
 0x1e8   : > { %v3277_v48 = vld [vmem:[%s4124_s1 + $0x6] ss:$0 sm:$0xff] }
 0x1e9   : > { %v805_v15 = vmul.f32 0.0625, %v772_v46  ;;  %v808_v51 = vsel %vm252_vm0, %v806_v9, 0.0  ;;  %v936_v46 = vld [vmem:[#allocation2 + $0x18] sm:$0xff]  ;;  %v972_v9 = vmul.f32 %v3256_v28, %v935_v34  ;;  %v1038_v34 = vld [vmem:[#allocation2 + $0x21] sm:$0xff] }
 0x1eb   : > { %v807_v13 = vsel %vm252_vm0, %v805_v15, 0.0  ;;  %v1036_v15 = vld [vmem:[#allocation2 + $0x9] sm:$0xff] }
 0x1ec   : > { %v809_v52 = vadd.f32 %v808_v51, %v807_v13  ;;  %v1104_v51 = vadd.f32 %v1072_v32, %v1003_v35  ;;  %v1173_v13 = vmul.f32 %v3277_v48, %v1136_v39  ;;  %v3303_v39 = vld [vmem:[%s4124_s1 + $0x9] ss:$0 sm:$0xff] }
 0x1ee   : > { %v810_v63 = vrot.slane %v809_v52, 4 }
 0x1f0   : > { %v811_v47 = vadd.f32 %v810_v63, %v809_v52  ;;  %v3284_v52 = vld [vmem:[%s4124_s1 + $0x7] ss:$0 sm:$0xff]  ;;  %v973_v63 = vmul.f32 %v3256_v28, %v936_v46 }
 0x1f2   : > { %v812_v8 = vrot.slane %v811_v47, 2 }
 0x1f4   : > { %v813_v29 = vadd.f32 %v812_v8, %v811_v47  ;;  %v937_v47 = vld [vmem:[#allocation2 + $0x20] sm:$0xff]  ;;  %v1004_v8 = vadd.f32 %v3265_v44, %v972_v9  ;;  %v939_v9 = vld [vmem:[#allocation2 + $0x38] sm:$0xff] }
 0x1f5   : > { %v1277_v49 = vmul.f32 %v3284_v52, %v939_v9 }
 0x1f6   : > { %v814_v38 = vrot.slane %v813_v29, 1 }
 0x1f8   : > { %v815_v37 = vadd.f32 %v814_v38, %v813_v29  ;;  %v1073_v29 = vmul.f32 %v3270_v0, %v1036_v15  ;;  %v1137_v38 = vld [vmem:[#allocation2 + $0xa] sm:$0xff] }
 0x1f9   : > { %v1174_v24 = vmul.f32 %v3277_v48, %v1137_v38 }
 0x1fa   : > { %v816_v10 = vmul.f32 0.0625, %v815_v37  ;;  %v1205_v37 = vadd.f32 %v1173_v13, %v1104_v51  ;;  %v1105_v42 = vadd.f32 %v1073_v29, %v1004_v8  ;;  %v1075_v13 = vmul.f32 %v3270_v0, %v1038_v34  ;;  %v1139_v8 = vld [vmem:[#allocation2 + $0x22] sm:$0xff] }
 0x1fb   : > { %v1176_v7 = vmul.f32 %v3277_v48, %v1139_v8 }
 0x1fc   : > { %v819_v12 = vmul.f32 %v817_v4, %v816_v10  ;;  %v1037_v4 = vld [vmem:[#allocation2 + $0x19] sm:$0xff]  ;;  %v1274_v10 = vmul.f32 %v3284_v52, %v936_v46  ;;  %v1206_v51 = vadd.f32 %v1174_v24, %v1105_v42  ;;  %v3317_v42 = vld [vmem:[%s4124_s1 + $0xa] ss:$0 sm:$0xff] }
 0x1fd   : > { %v1375_v15 = vmul.f32 %v3296_v3, %v1037_v4 }
 0x1fe   : > { %v821_v18 = vsel %vm820_vm1, %v819_v12, 0.0  ;;  %v974_v12 = vmul.f32 %v3256_v28, %v937_v47 }
 0x1ff   : > { %822 = vadd.xlane.f32.xlu0 %v821_v18  ;;  %v1005_v18 = vadd.f32 %v3265_v44, %v973_v63  ;;  %v1275_v63 = vmul.f32 %v3284_v52, %v937_v47 }
 0x200   : > { %v1006_v35 = vadd.f32 %v3265_v44, %v974_v12  ;;  %v976_v12 = vmul.f32 %v3256_v28, %v939_v9 }
 0x201   : > { %v1307_v57 = vadd.f32 %v1275_v63, %v1206_v51 }
 0x202   : > { %v1107_v38 = vadd.f32 %v1075_v13, %v1006_v35  ;;  %v1376_v35 = vmul.f32 %v3296_v3, %v1038_v34 }
 0x204   : > { %v1408_v63 = vadd.f32 %v1376_v35, %v1307_v57 }
 0x288   : > { %v823_v1 = vpop.xlane.xlu0 %822 }
 0x289   : > { %v825_v14 = vadd.f32 %v824_v26, %v823_v1  ;;  %v938_v26 = vld [vmem:[#allocation2 + $0x30] sm:$0xff]  ;;  %v1074_v1 = vmul.f32 %v3270_v0, %v1037_v4 }
 0x28a   : > { %v975_v46 = vmul.f32 %v3256_v28, %v938_v26  ;;  %v1140_v4 = vld [vmem:[#allocation2 + $0x32] sm:$0xff]  ;;  %v1276_v24 = vmul.f32 %v3284_v52, %v938_v26  ;;  %v1578_v53 = vmul.f32 %v3317_v42, %v938_v26 }
 0x28b   : > { %v826_v30 = vmax.f32 %v825_v14, 0.0  ;;  %v1306_v14 = vadd.f32 %v1274_v10, %v1205_v37  ;;  %v1106_v32 = vadd.f32 %v1074_v1, %v1005_v18  ;;  %v1476_v37 = vmul.f32 %v3303_v39, %v1138_v60  ;;  %v1039_v10 = vld [vmem:[#allocation2 + $0x31] sm:$0xff] }
 0x28c   : > { %v1007_v1 = vadd.f32 %v3265_v44, %v975_v46  ;;  %v1076_v47 = vmul.f32 %v3270_v0, %v1039_v10  ;;  %v940_v46 = vld [vmem:[#allocation2 + $0x48] sm:$0xff]  ;;  %v1177_v13 = vmul.f32 %v3277_v48, %v1140_v4  ;;  %v1377_v34 = vmul.f32 %v3296_v3, %v1039_v10  ;;  %v941_v26 = vld [vmem:[#allocation2 + $0x50] sm:$0xff] }
 0x28d   : > { %829 = vperm.xlu1 %2143, %v826_v30   ;;  %v1175_v30 = vmul.f32 %v3277_v48, %v1138_v60  ;;  %v1407_v29 = vadd.f32 %v1375_v15, %v1306_v14  ;;  %v1040_v60 = vld [vmem:[#allocation2 + $0x39] sm:$0xff]  ;;  %v1208_v14 = vadd.f32 %v1176_v7, %v1107_v38  ;;  %v3330_v7 = vld [vmem:[%s4124_s1 + $0xb] ss:$0 sm:$0xff]  ;;  %v977_v38 = vmul.f32 %v3256_v28, %v940_v46 }
 0x28e   : > { %v1108_v15 = vadd.f32 %v1076_v47, %v1007_v1  ;;  %v1077_v40 = vmul.f32 %v3270_v0, %v1040_v60  ;;  %v1679_v35 = vmul.f32 %v3330_v7, %v1039_v10  ;;  %v1378_v62 = vmul.f32 %v3296_v3, %v1040_v60 }
 0x28f   : > { %v1207_v18 = vadd.f32 %v1175_v30, %v1106_v32  ;;  %v1508_v32 = vadd.f32 %v1476_v37, %v1407_v29  ;;  %v1008_v30 = vadd.f32 %v3265_v44, %v976_v12  ;;  %v1141_v29 = vld [vmem:[#allocation2 + $0x3a] sm:$0xff]  ;;  %v1477_v37 = vmul.f32 %v3303_v39, %v1139_v8 }
 0x290   : > { %v1209_v47 = vadd.f32 %v1177_v13, %v1108_v15  ;;  %v1178_v45 = vmul.f32 %v3277_v48, %v1141_v29  ;;  %v978_v8 = vmul.f32 %v3256_v28, %v941_v26  ;;  %v1142_v15 = vld [vmem:[#allocation2 + $0x4a] sm:$0xff]  ;;  %v1579_v13 = vmul.f32 %v3317_v42, %v939_v9 }
 0x291   : > { %v1308_v51 = vadd.f32 %v1276_v24, %v1207_v18  ;;  %v1610_v12 = vadd.f32 %v1578_v53, %v1508_v32  ;;  %v1109_v57 = vadd.f32 %v1077_v40, %v1008_v30  ;;  %v1309_v18 = vadd.f32 %v1277_v49, %v1208_v14 }
 0x292   : > { %v1509_v24 = vadd.f32 %v1477_v37, %v1408_v63  ;;  %v1478_v53 = vmul.f32 %v3303_v39, %v1140_v4  ;;  %v1009_v49 = vadd.f32 %v3265_v44, %v977_v38  ;;  %v1278_v40 = vmul.f32 %v3284_v52, %v940_v46  ;;  %v942_v37 = vld [vmem:[#allocation2 + $0x60] sm:$0xff] }
 0x293   : > { %v1409_v1 = vadd.f32 %v1377_v34, %v1308_v51  ;;  %v1711_v14 = vadd.f32 %v1679_v35, %v1610_v12  ;;  %v1210_v10 = vadd.f32 %v1178_v45, %v1109_v57  ;;  %v1410_v32 = vadd.f32 %v1378_v62, %v1309_v18 }
 0x294   : > { %v1479_v30 = vmul.f32 %v3303_v39, %v1141_v29  ;;  %v1078_v63 = vmul.f32 %v3270_v0, %v1041_v61  ;;  %v1310_v34 = vadd.f32 %v1278_v40, %v1209_v47  ;;  %v1680_v23 = vmul.f32 %v3330_v7, %v1040_v60  ;;  %v943_v60 = vld [vmem:[#allocation2 + $0x68] sm:$0xff] }
 0x295   : > { %v1510_v51 = vadd.f32 %v1478_v53, %v1409_v1  ;;  %v1780_v38 = vmul.f32 %v3341_v11, %v1140_v4  ;;  %v1279_v45 = vmul.f32 %v3284_v52, %v941_v26  ;;  %v1580_v12 = vmul.f32 %v3317_v42, %v940_v46 }
 0x296   : > { %v1110_v62 = vadd.f32 %v1078_v63, %v1009_v49  ;;  %v1010_v57 = vadd.f32 %v3265_v44, %v978_v8  ;;  %v1179_v9 = vmul.f32 %v3277_v48, %v1142_v15  ;;  %v1511_v18 = vadd.f32 %v1479_v30, %v1410_v32  ;;  %v1143_v49 = vld [vmem:[#allocation2 + $0x52] sm:$0xff] }
 0x297   : > { %v1611_v1 = vadd.f32 %v1579_v13, %v1509_v24  ;;  %v1311_v47 = vadd.f32 %v1279_v45, %v1210_v10  ;;  %v979_v35 = vmul.f32 %v3256_v28, %v942_v37  ;;  %v1781_v4 = vmul.f32 %v3341_v11, %v1141_v29  ;;  %v1043_v13 = vld [vmem:[#allocation2 + $0x61] sm:$0xff] }
 0x298   : > { %v1411_v53 = vadd.f32 %v1379_v6, %v1310_v34  ;;  %v1612_v40 = vadd.f32 %v1580_v12, %v1510_v51  ;;  %v3360_v33 = vadd.f32 %v1780_v38, %v1711_v14  ;;  %v1681_v46 = vmul.f32 %v3330_v7, %v1041_v61  ;;  %v1144_v12 = vld [vmem:[#allocation2 + $0x62] sm:$0xff] }
 0x299   : > { %v1380_v8 = vmul.f32 %v3296_v3, %v1042_v56  ;;  %v1581_v32 = vmul.f32 %v3317_v42, %v941_v26  ;;  %v1111_v24 = vadd.f32 %v1079_v54, %v1010_v57  ;;  %v1211_v10 = vadd.f32 %v1179_v9, %v1110_v62  ;;  %v944_v9 = vld [vmem:[#allocation2 + $0x78] sm:$0xff] }
 0x29a   : > { %4196 = vst [vmem:[#allocation39_spill] sm:$0xff] %v3360_v33  ;;  %v1480_v30 = vmul.f32 %v3303_v39, %v1142_v15  ;;  %v980_v29 = vmul.f32 %v3256_v28, %v943_v60  ;;  %v1712_v6 = vadd.f32 %v1680_v23, %v1611_v1  ;;  %v1011_v14 = vadd.f32 %v3265_v44, %v979_v35  ;;  %v1044_v23 = vld [vmem:[#allocation2 + $0x69] sm:$0xff] }
 0x29b   : > { %v1412_v51 = vadd.f32 %v1380_v8, %v1311_v47  ;;  %v1613_v63 = vadd.f32 %v1581_v32, %v1511_v18  ;;  %v1713_v34 = vadd.f32 %v1681_v46, %v1612_v40  ;;  %v1180_v61 = vmul.f32 %v3277_v48, %v1143_v49 }
 0x29c   : > { %v1512_v38 = vadd.f32 %v1480_v30, %v1411_v53  ;;  %v1280_v45 = vmul.f32 %v3284_v52, %v942_v37  ;;  %v1481_v54 = vmul.f32 %v3303_v39, %v1143_v49  ;;  %v1682_v26 = vmul.f32 %v3330_v7, %v1042_v56 }
 0x29d   : > { %v1782_v62 = vmul.f32 %v3341_v11, %v1142_v15  ;;  %v1080_v57 = vmul.f32 %v3270_v0, %v1043_v13  ;;  %v1212_v18 = vadd.f32 %v1180_v61, %v1111_v24  ;;  %v1582_v47 = vmul.f32 %v3317_v42, %v942_v37 }
 0x29e   : > { %v1312_v1 = vadd.f32 %v1280_v45, %v1211_v10  ;;  %v1012_v35 = vadd.f32 %v3265_v44, %v980_v29  ;;  %v1513_v53 = vadd.f32 %v1481_v54, %v1412_v51  ;;  %v1714_v40 = vadd.f32 %v1682_v26, %v1613_v63  ;;  %v1145_v10 = vld [vmem:[#allocation2 + $0x6a] sm:$0xff] }
 0x29f   : > { %v1112_v46 = vadd.f32 %v1080_v57, %v1011_v14  ;;  %v1181_v8 = vmul.f32 %v3277_v48, %v1144_v12  ;;  %v1381_v32 = vmul.f32 %v3296_v3, %v1043_v13  ;;  %v1614_v56 = vadd.f32 %v1582_v47, %v1512_v38  ;;  %v945_v38 = vld [vmem:[#allocation2 + $0x80] sm:$0xff] }
 0x2a0   : > { %v1081_v15 = vmul.f32 %v3270_v0, %v1044_v23  ;;  %v981_v30 = vmul.f32 %v3256_v28, %v944_v9  ;;  %v3380_v33 = vadd.f32 %v1781_v4, %v1712_v6  ;;  %v1783_v24 = vmul.f32 %v3341_v11, %v1143_v49  ;;  %v1045_v6 = vld [vmem:[#allocation2 + $0x79] sm:$0xff] }
 0x2a1   : > { %v1281_v37 = vmul.f32 %v3284_v52, %v943_v60  ;;  %v1583_v29 = vmul.f32 %v3317_v42, %v943_v60  ;;  %v3385_v51 = vadd.f32 %v1782_v62, %v1713_v34  ;;  %v1413_v63 = vadd.f32 %v1381_v32, %v1312_v1  ;;  %v3399_v32 = vld [vmem:[#allocation2 + $0x98] sm:$0xff] }
 0x2a2   : > { %4197 = vst [vmem:[#allocation40_spill] sm:$0xff] %v3380_v33  ;;  %v1683_v14 = vmul.f32 %v3330_v7, %v1043_v13  ;;  %v1113_v61 = vadd.f32 %v1081_v15, %v1012_v35  ;;  %v3388_v45 = vadd.f32 %v1783_v24, %v1714_v40  ;;  %v1213_v54 = vadd.f32 %v1181_v8, %v1112_v46  ;;  %v1146_v35 = vld [vmem:[#allocation2 + $0x7a] sm:$0xff]  ;;  %v946_v40 = vld [vmem:[#allocation2 + $0x90] sm:$0xff] }
 0x2a3   : > { %4198 = vst [vmem:[#allocation41_spill] sm:$0xff] %v3385_v51  ;;  %v1313_v26 = vadd.f32 %v1281_v37, %v1212_v18  ;;  %v1615_v4 = vadd.f32 %v1583_v29, %v1513_v53  ;;  %v1182_v49 = vmul.f32 %v3277_v48, %v1145_v10  ;;  %v1482_v47 = vmul.f32 %v3303_v39, %v1144_v12  ;;  %v1046_v37 = vld [vmem:[#allocation2 + $0x81] sm:$0xff] }
 0x2a4   : > { %4199 = vst [vmem:[#allocation42_spill] sm:$0xff] %v3388_v45  ;;  %v1715_v57 = vadd.f32 %v1683_v14, %v1614_v56  ;;  %v1013_v60 = vadd.f32 %v3265_v44, %v981_v30  ;;  %v1382_v34 = vmul.f32 %v3296_v3, %v1044_v23  ;;  %v1684_v62 = vmul.f32 %v3330_v7, %v1044_v23  ;;  %v1047_v45 = vld [vmem:[#allocation2 + $0x91] sm:$0xff] }
 0x2a5   : > { %v1282_v13 = vmul.f32 %v3284_v52, %v944_v9  ;;  %v982_v1 = vmul.f32 %v3256_v28, %v945_v38  ;;  %v1214_v18 = vadd.f32 %v1182_v49, %v1113_v61  ;;  %v1514_v53 = vadd.f32 %v1482_v47, %v1413_v63  ;;  %v1147_v47 = vld [vmem:[#allocation2 + $0x82] sm:$0xff] }
 0x2a6   : > { %v1784_v46 = vmul.f32 %v3341_v11, %v1144_v12  ;;  %v1082_v8 = vmul.f32 %v3270_v0, %v1045_v6  ;;  %v1414_v56 = vadd.f32 %v1382_v34, %v1313_v26  ;;  %v1716_v15 = vadd.f32 %v1684_v62, %v1615_v4 }
 0x2a7   : > { %v1314_v30 = vadd.f32 %v1282_v13, %v1213_v54  ;;  %v1584_v24 = vmul.f32 %v3317_v42, %v944_v9  ;;  %v1183_v29 = vmul.f32 %v3277_v48, %v1146_v35  ;;  %v1283_v14 = vmul.f32 %v3284_v52, %v945_v38 }
 0x2a8   : > { %v1114_v23 = vadd.f32 %v1082_v8, %v1013_v60  ;;  %v983_v61 = vmul.f32 %v3256_v28, %v946_v40  ;;  %v1483_v63 = vmul.f32 %v3303_v39, %v1145_v10  ;;  %v1383_v12 = vmul.f32 %v3296_v3, %v1045_v6 }
 0x2a9   : > { %v1014_v49 = vadd.f32 %v3265_v44, %v982_v1  ;;  %v984_v26 = vmul.f32 %v3256_v28, %v3399_v32  ;;  %v1785_v54 = vmul.f32 %v3341_v11, %v1145_v10  ;;  %v3411_v9 = vadd.f32 %v1784_v46, %v1715_v57  ;;  %v1048_v10 = vld [vmem:[#allocation2 + $0x99] sm:$0xff] }
 0x2aa   : > { %v1616_v4 = vadd.f32 %v1584_v24, %v1514_v53  ;;  %v1315_v60 = vadd.f32 %v1283_v14, %v1214_v18  ;;  %v1515_v34 = vadd.f32 %v1483_v63, %v1414_v56  ;;  %v1415_v62 = vadd.f32 %v1383_v12, %v1314_v30  ;;  %v1148_v56 = vld [vmem:[#allocation2 + $0x92] sm:$0xff] }
 0x2ab   : > { %4200 = vst [vmem:[#allocation43_spill] sm:$0xff] %v3411_v9  ;;  %v1685_v13 = vmul.f32 %v3330_v7, %v1045_v6  ;;  %v1083_v8 = vmul.f32 %v3270_v0, %v1046_v37  ;;  %v3415_v51 = vadd.f32 %v1785_v54, %v1716_v15  ;;  %v1215_v1 = vadd.f32 %v1183_v29, %v1114_v23  ;;  %v1149_v54 = vld [vmem:[#allocation2 + $0x9a] sm:$0xff]  ;;  %v949_v9 = vld [vmem:[#allocation2 + $0xb0] sm:$0xff] }
 0x2ac   : > { %v1384_v33 = vmul.f32 %v3296_v3, %v1046_v37  ;;  %v1015_v59 = vadd.f32 %v3265_v44, %v983_v61  ;;  %v1184_v53 = vmul.f32 %v3277_v48, %v1147_v47  ;;  %v1484_v18 = vmul.f32 %v3303_v39, %v1146_v35 }
 0x2ad   : > { %4201 = vst [vmem:[#allocation44_spill] sm:$0xff] %v3415_v51  ;;  %v1115_v57 = vadd.f32 %v1083_v8, %v1014_v49  ;;  %v1016_v46 = vadd.f32 %v3265_v44, %v984_v26  ;;  %v1717_v6 = vadd.f32 %v1685_v13, %v1616_v4  ;;  %v1084_v24 = vmul.f32 %v3270_v0, %v1047_v45  ;;  %v948_v4 = vld [vmem:[#allocation2 + $0xa8] sm:$0xff] }
 0x2ae   : > { %v1416_v30 = vadd.f32 %v1384_v33, %v1315_v60  ;;  %v1284_v15 = vmul.f32 %v3284_v52, %v946_v40  ;;  %v1485_v23 = vmul.f32 %v3303_v39, %v1147_v47  ;;  %v1516_v29 = vadd.f32 %v1484_v18, %v1415_v62 }
 0x2af   : > { %v1585_v14 = vmul.f32 %v3317_v42, %v945_v38  ;;  %v1085_v61 = vmul.f32 %v3270_v0, %v1048_v10  ;;  %v1686_v63 = vmul.f32 %v3330_v7, %v1046_v37  ;;  %v1116_v12 = vadd.f32 %v1084_v24, %v1015_v59 }
 0x2b0   : > { %v1316_v49 = vadd.f32 %v1284_v15, %v1215_v1  ;;  %v1185_v26 = vmul.f32 %v3277_v48, %v1148_v56  ;;  %v1216_v33 = vadd.f32 %v1184_v53, %v1115_v57  ;;  %v1786_v60 = vmul.f32 %v3341_v11, %v1146_v35 }
 0x2b1   : > { %v1586_v13 = vmul.f32 %v3317_v42, %v946_v40  ;;  %v1117_v8 = vadd.f32 %v1085_v61, %v1016_v46  ;;  %v1517_v51 = vadd.f32 %v1485_v23, %v1416_v30  ;;  %v1617_v62 = vadd.f32 %v1585_v14, %v1515_v34  ;;  %v1049_v14 = vld [vmem:[#allocation2 + $0xa9] sm:$0xff] }
 0x2b2   : > { %v1787_v38 = vmul.f32 %v3341_v11, %v1147_v47  ;;  %v1385_v18 = vmul.f32 %v3296_v3, %v1047_v45  ;;  %v1186_v59 = vmul.f32 %v3277_v48, %v1149_v54  ;;  %v1285_v1 = vmul.f32 %v3284_v52, %v3399_v32 }
 0x2b3   : > { %v1618_v37 = vadd.f32 %v1586_v13, %v1516_v29  ;;  %v985_v57 = vmul.f32 %v3256_v28, %v948_v4  ;;  %v3437_v53 = vadd.f32 %v1786_v60, %v1717_v6  ;;  %v1217_v40 = vadd.f32 %v1185_v26, %v1116_v12  ;;  %v1150_v13 = vld [vmem:[#allocation2 + $0xaa] sm:$0xff] }
 0x2b4   : > { %v1417_v35 = vadd.f32 %v1385_v18, %v1316_v49  ;;  %v1587_v34 = vmul.f32 %v3317_v42, %v3399_v32  ;;  %v1687_v47 = vmul.f32 %v3330_v7, %v1047_v45  ;;  %v1218_v46 = vadd.f32 %v1186_v59, %v1117_v8 }
 0x2b5   : > { %4202 = vst [vmem:[#allocation45_spill] sm:$0xff] %v3437_v53  ;;  %v1317_v30 = vadd.f32 %v1285_v1, %v1216_v33  ;;  %v986_v24 = vmul.f32 %v3256_v28, %v949_v9  ;;  %v1718_v15 = vadd.f32 %v1686_v63, %v1617_v62  ;;  %v1486_v23 = vmul.f32 %v3303_v39, %v1148_v56  ;;  %v1050_v63 = vld [vmem:[#allocation2 + $0xb1] sm:$0xff] }
 0x2b6   : > { %v1619_v29 = vadd.f32 %v1587_v34, %v1517_v51  ;;  %v1286_v61 = vmul.f32 %v3284_v52, %v948_v4  ;;  %v1719_v6 = vadd.f32 %v1687_v47, %v1618_v37  ;;  %v1386_v49 = vmul.f32 %v3296_v3, %v1048_v10  ;;  %v950_v47 = vld [vmem:[#allocation2 + $0xc0] sm:$0xff] }
 0x2b7   : > { %v1017_v12 = vadd.f32 %v3265_v44, %v985_v57  ;;  %v1287_v32 = vmul.f32 %v3284_v52, %v949_v9  ;;  %v1487_v45 = vmul.f32 %v3303_v39, %v1149_v54  ;;  %v1518_v26 = vadd.f32 %v1486_v23, %v1417_v35 }
 0x2b8   : > { %v1688_v33 = vmul.f32 %v3330_v7, %v1048_v10  ;;  %v1318_v60 = vadd.f32 %v1286_v61, %v1217_v40  ;;  %v1418_v8 = vadd.f32 %v1386_v49, %v1317_v30  ;;  %v1086_v51 = vmul.f32 %v3270_v0, %v1049_v14 }
 0x2b9   : > { %v1018_v62 = vadd.f32 %v3265_v44, %v986_v24  ;;  %v1319_v18 = vadd.f32 %v1287_v32, %v1218_v46  ;;  %v1788_v59 = vmul.f32 %v3341_v11, %v1148_v56  ;;  %v1387_v1 = vmul.f32 %v3296_v3, %v1049_v14  ;;  %v1571_v32 = vld [vmem:[#allocation2 + $0x198] sm:$0xff] }
 0x2ba   : > { %v1720_v37 = vadd.f32 %v1688_v33, %v1619_v29  ;;  %v1588_v57 = vmul.f32 %v3317_v42, %v948_v4  ;;  %v1118_v34 = vadd.f32 %v1086_v51, %v1017_v12  ;;  %v1087_v35 = vmul.f32 %v3270_v0, %v1050_v63  ;;  %v1151_v29 = vld [vmem:[#allocation2 + $0xb2] sm:$0xff]  ;;  %v951_v12 = vld [vmem:[#allocation2 + $0xc8] sm:$0xff] }
 0x2bb   : > { %v1187_v10 = vmul.f32 %v3277_v48, %v1150_v13  ;;  %v1388_v40 = vmul.f32 %v3296_v3, %v1050_v63  ;;  %v3458_v30 = vadd.f32 %v1787_v38, %v1718_v15  ;;  %v1789_v24 = vmul.f32 %v3341_v11, %v1149_v54 }
 0x2bc   : > { %v1419_v46 = vadd.f32 %v1387_v1, %v1318_v60  ;;  %v1620_v23 = vadd.f32 %v1588_v57, %v1518_v26  ;;  %v1519_v56 = vadd.f32 %v1487_v45, %v1418_v8  ;;  %v3461_v61 = vadd.f32 %v1788_v59, %v1719_v6  ;;  %v1572_v45 = vld [vmem:[#allocation2 + $0x1a0] sm:$0xff] }
 0x2bd   : > { %4203 = vst [vmem:[#allocation46_spill] sm:$0xff] %v3458_v30  ;;  %v1119_v49 = vadd.f32 %v1087_v35, %v1018_v62  ;;  %v1420_v4 = vadd.f32 %v1388_v40, %v1319_v18  ;;  %v3463_v33 = vadd.f32 %v1789_v24, %v1720_v37  ;;  %v1689_v51 = vmul.f32 %v3330_v7, %v1049_v14  ;;  %v1051_v1 = vld [vmem:[#allocation2 + $0xc1] sm:$0xff]  ;;  %v1052_v24 = vld [vmem:[#allocation2 + $0xc9] sm:$0xff] }
 0x2be   : > { %4204 = vst [vmem:[#allocation47_spill] sm:$0xff] %v3461_v61  ;;  %v1488_v53 = vmul.f32 %v3303_v39, %v1150_v13  ;;  %v987_v38 = vmul.f32 %v3256_v28, %v950_v47  ;;  %v1188_v54 = vmul.f32 %v3277_v48, %v1151_v29  ;;  %v1219_v15 = vadd.f32 %v1187_v10, %v1118_v34  ;;  %v1153_v61 = vld [vmem:[#allocation2 + $0xca] sm:$0xff] }
 0x2bf   : > { %4205 = vst [vmem:[#allocation48_spill] sm:$0xff] %v3463_v33  ;;  %v1489_v26 = vmul.f32 %v3303_v39, %v1151_v29  ;;  %v1589_v6 = vmul.f32 %v3317_v42, %v949_v9  ;;  %v1721_v60 = vadd.f32 %v1689_v51, %v1620_v23  ;;  %v988_v62 = vmul.f32 %v3256_v28, %v951_v12 }
 0x2c0   : > { %v1520_v8 = vadd.f32 %v1488_v53, %v1419_v46  ;;  %v3473_v18 = vmul.f32 %v3317_v42, %v1571_v32  ;;  %v1220_v14 = vadd.f32 %v1188_v54, %v1119_v49  ;;  %v1288_v57 = vmul.f32 %v3284_v52, %v950_v47  ;;  %v1152_v46 = vld [vmem:[#allocation2 + $0xc2] sm:$0xff]  ;;  %v952_v49 = vld [vmem:[#allocation2 + $0xd8] sm:$0xff] }
 0x2c1   : > { %v1521_v37 = vadd.f32 %v1489_v26, %v1420_v4  ;;  %v1621_v59 = vadd.f32 %v1589_v6, %v1519_v56  ;;  %v1690_v34 = vmul.f32 %v3330_v7, %v1050_v63  ;;  %v1019_v35 = vadd.f32 %v3265_v44, %v987_v38 }
 0x2c2   : > { %v1590_v9 = vmul.f32 %v3317_v42, %v950_v47  ;;  %v3480_v10 = vmul.f32 %v3317_v42, %v1572_v45  ;;  %v1790_v53 = vmul.f32 %v3341_v11, %v1150_v13  ;;  %v1320_v40 = vadd.f32 %v1288_v57, %v1219_v15  ;;  %v1672_v15 = vld [vmem:[#allocation2 + $0x199] sm:$0xff] }
 0x2c3   : > { %v1289_v23 = vmul.f32 %v3284_v52, %v951_v12  ;;  %v1591_v56 = vmul.f32 %v3317_v42, %v951_v12  ;;  %v1088_v4 = vmul.f32 %v3270_v0, %v1051_v1  ;;  %v1389_v63 = vmul.f32 %v3296_v3, %v1051_v1 }
 0x2c4   : > { %v1622_v32 = vadd.f32 %v1590_v9, %v1520_v8  ;;  %v1020_v47 = vadd.f32 %v3265_v44, %v988_v62  ;;  %v1722_v51 = vadd.f32 %v1690_v34, %v1621_v59  ;;  %v1691_v38 = vmul.f32 %v3330_v7, %v1051_v1  ;;  %v953_v1 = vld [vmem:[#allocation2 + $0xe0] sm:$0xff] }
 0x2c5   : > { %v1321_v54 = vadd.f32 %v1289_v23, %v1220_v14  ;;  %v1623_v13 = vadd.f32 %v1591_v56, %v1521_v37  ;;  %v1120_v26 = vadd.f32 %v1088_v4, %v1019_v35  ;;  %v1089_v6 = vmul.f32 %v3270_v0, %v1052_v24 }
 0x2c6   : > { %v1189_v45 = vmul.f32 %v3277_v48, %v1152_v46  ;;  %v989_v12 = vmul.f32 %v3256_v28, %v952_v49  ;;  %v1791_v57 = vmul.f32 %v3341_v11, %v1151_v29  ;;  %v1421_v33 = vadd.f32 %v1389_v63, %v1320_v40  ;;  %v1053_v40 = vld [vmem:[#allocation2 + $0xd9] sm:$0xff] }
 0x2c7   : > { %v1390_v8 = vmul.f32 %v3296_v3, %v1052_v24  ;;  %v1692_v62 = vmul.f32 %v3330_v7, %v1052_v24  ;;  %v3495_v59 = vadd.f32 %v1790_v53, %v1721_v60  ;;  %v1723_v14 = vadd.f32 %v1691_v38, %v1622_v32  ;;  %v3506_v53 = vld [vmem:[#allocation2 + $0xf0] sm:$0xff]  ;;  %v1154_v38 = vld [vmem:[#allocation2 + $0xda] sm:$0xff] }
 0x2c8   : > { %v1121_v37 = vadd.f32 %v1089_v6, %v1020_v47  ;;  %v3498_v34 = vmul.f32 %v3330_v7, %v1672_v15  ;;  %v3500_v35 = vadd.f32 %v1791_v57, %v1722_v51  ;;  %v1490_v23 = vmul.f32 %v3303_v39, %v1152_v46  ;;  %v1773_v6 = vld [vmem:[#allocation2 + $0x19a] sm:$0xff] }
 0x2c9   : > { %4206 = vst [vmem:[#allocation49_spill] sm:$0xff] %v3495_v59  ;;  %v1422_v9 = vadd.f32 %v1390_v8, %v1321_v54  ;;  %v1724_v29 = vadd.f32 %v1692_v62, %v1623_v13  ;;  %v1190_v56 = vmul.f32 %v3277_v48, %v1153_v61  ;;  %v1221_v4 = vadd.f32 %v1189_v45, %v1120_v26  ;;  %v1774_v8 = vld [vmem:[#allocation2 + $0x1a2] sm:$0xff] }
 0x2ca   : > { %4207 = vst [vmem:[#allocation50_spill] sm:$0xff] %v3500_v35  ;;  %v1792_v24 = vmul.f32 %v3341_v11, %v1152_v46  ;;  %v1021_v60 = vadd.f32 %v3265_v44, %v989_v12  ;;  %v1491_v63 = vmul.f32 %v3303_v39, %v1153_v61  ;;  %v1522_v32 = vadd.f32 %v1490_v23, %v1421_v33  ;;  %v1673_v46 = vld [vmem:[#allocation2 + $0x1a1] sm:$0xff]  ;;  %v3520_v33 = vld [vmem:[#allocation2 + $0xf8] sm:$0xff] }
 0x2cb   : > { %v1793_v47 = vmul.f32 %v3341_v11, %v1153_v61  ;;  %v990_v51 = vmul.f32 %v3256_v28, %v953_v1  ;;  %v1222_v54 = vadd.f32 %v1190_v56, %v1121_v37  ;;  %v1090_v15 = vmul.f32 %v3270_v0, %v1053_v40  ;;  %v1054_v37 = vld [vmem:[#allocation2 + $0xe1] sm:$0xff] }
 0x2cc   : > { %v3511_v13 = vadd.f32 %v1792_v24, %v1723_v14  ;;  %v1290_v26 = vmul.f32 %v3284_v52, %v952_v49  ;;  %v1523_v45 = vadd.f32 %v1491_v63, %v1422_v9  ;;  %v1592_v57 = vmul.f32 %v3317_v42, %v952_v49  ;;  %v1155_v23 = vld [vmem:[#allocation2 + $0xe2] sm:$0xff] }
 0x2cd   : > { %v3515_v12 = vadd.f32 %v1793_v47, %v1724_v29  ;;  %v991_v61 = vmul.f32 %v3256_v28, %v3506_v53  ;;  %v1122_v62 = vadd.f32 %v1090_v15, %v1021_v60  ;;  %v1191_v56 = vmul.f32 %v3277_v48, %v1154_v38  ;;  %v1055_v60 = vld [vmem:[#allocation2 + $0xf1] sm:$0xff]  ;;  %v956_v35 = vld [vmem:[#allocation2 + $0x108] sm:$0xff] }
 0x2ce   : > { %4208 = vst [vmem:[#allocation51_spill] sm:$0xff] %v3511_v13  ;;  %v1322_v14 = vadd.f32 %v1290_v26, %v1221_v4  ;;  %v1291_v24 = vmul.f32 %v3284_v52, %v953_v1  ;;  %v1624_v13 = vadd.f32 %v1592_v57, %v1522_v32  ;;  %v1022_v9 = vadd.f32 %v3265_v44, %v990_v51 }
 0x2cf   : > { %4209 = vst [vmem:[#allocation52_spill] sm:$0xff] %v3515_v12  ;;  %v3526_v29 = vmul.f32 %v3330_v7, %v1673_v46  ;;  %v3529_v49 = vmul.f32 %v3341_v11, %v1773_v6  ;;  %v1391_v63 = vmul.f32 %v3296_v3, %v1053_v40  ;;  %v992_v4 = vmul.f32 %v3256_v28, %v3520_v33 }
 0x2d0   : > { %v1323_v47 = vadd.f32 %v1291_v24, %v1222_v54  ;;  %v3535_v15 = vmul.f32 %v3341_v11, %v1774_v8  ;;  %v1693_v32 = vmul.f32 %v3330_v7, %v1053_v40  ;;  %v1091_v51 = vmul.f32 %v3270_v0, %v1054_v37  ;;  %v3543_v24 = vld [vmem:[#allocation2 + $0xf2] sm:$0xff] }
 0x2d1   : > { %v1192_v26 = vmul.f32 %v3277_v48, %v1155_v23  ;;  %v1023_v46 = vadd.f32 %v3265_v44, %v991_v61  ;;  %v1423_v6 = vadd.f32 %v1391_v63, %v1322_v14  ;;  %v1223_v57 = vadd.f32 %v1191_v56, %v1122_v62 }
 0x2d2   : > { %v1392_v12 = vmul.f32 %v3296_v3, %v1054_v37  ;;  %v1492_v54 = vmul.f32 %v3303_v39, %v1154_v38  ;;  %v1725_v59 = vadd.f32 %v1693_v32, %v1624_v13  ;;  %v1123_v8 = vadd.f32 %v1091_v51, %v1022_v9 }
 0x2d3   : > { %v1593_v30 = vmul.f32 %v3317_v42, %v953_v1  ;;  %v1092_v40 = vmul.f32 %v3270_v0, %v1055_v60  ;;  %v1794_v21 = vmul.f32 %v3341_v11, %v1154_v38  ;;  %v1292_v61 = vmul.f32 %v3284_v52, %v3506_v53 }
 0x2d4   : > { %v1424_v25 = vadd.f32 %v1392_v12, %v1323_v47  ;;  %v1024_v62 = vadd.f32 %v3265_v44, %v992_v4  ;;  %v1193_v63 = vmul.f32 %v3277_v48, %v3543_v24  ;;  %v993_v13 = vmul.f32 %v3256_v28, %v956_v35 }
 0x2d5   : > { %v1625_v14 = vadd.f32 %v1593_v30, %v1523_v45  ;;  %v1124_v56 = vadd.f32 %v1092_v40, %v1023_v46  ;;  %v1493_v1 = vmul.f32 %v3303_v39, %v1155_v23  ;;  %v1524_v9 = vadd.f32 %v1492_v54, %v1423_v6  ;;  %v1157_v30 = vld [vmem:[#allocation2 + $0xfa] sm:$0xff]  ;;  %v957_v54 = vld [vmem:[#allocation2 + $0x110] sm:$0xff] }
 0x2d6   : > { %v1324_v32 = vadd.f32 %v1292_v61, %v1223_v57  ;;  %v1093_v12 = vmul.f32 %v3270_v0, %v1056_v22  ;;  %v1224_v47 = vadd.f32 %v1192_v26, %v1123_v8  ;;  %v1694_v38 = vmul.f32 %v3330_v7, %v1054_v37  ;;  %v3568_v8 = vld [vmem:[#allocation2 + $0x10a] sm:$0xff] }
 0x2d7   : > { %v1795_v51 = vmul.f32 %v3341_v11, %v1155_v23  ;;  %v3558_v36 = vadd.f32 %v1794_v21, %v1725_v59  ;;  %v1525_v45 = vadd.f32 %v1493_v1, %v1424_v25  ;;  %v1393_v4 = vmul.f32 %v3296_v3, %v1055_v60 }
 0x2d8   : > { %v1594_v46 = vmul.f32 %v3317_v42, %v3506_v53  ;;  %v1125_v40 = vadd.f32 %v1093_v12, %v1024_v62  ;;  %v1726_v6 = vadd.f32 %v1694_v38, %v1625_v14  ;;  %v1225_v57 = vadd.f32 %v1193_v63, %v1124_v56 }
 0x2d9   : > { %4210 = vst [vmem:[#allocation53_spill] sm:$0xff] %v3558_v36  ;;  %v1293_v26 = vmul.f32 %v3284_v52, %v3520_v33  ;;  %v1025_v37 = vadd.f32 %v3265_v44, %v993_v13  ;;  %v1425_v23 = vadd.f32 %v1393_v4, %v1324_v32  ;;  %v1695_v59 = vmul.f32 %v3330_v7, %v1055_v60 }
 0x2da   : > { %v1626_v21 = vadd.f32 %v1594_v46, %v1524_v9  ;;  %v1194_v25 = vmul.f32 %v3277_v48, %v1157_v30  ;;  %v1595_v53 = vmul.f32 %v3317_v42, %v3520_v33  ;;  %v1094_v62 = vmul.f32 %v3270_v0, %v1057_v58 }
 0x2db   : > { %v1325_v61 = vadd.f32 %v1293_v26, %v1224_v47  ;;  %v1294_v14 = vmul.f32 %v3284_v52, %v956_v35  ;;  %v1394_v63 = vmul.f32 %v3296_v3, %v1056_v22  ;;  %v1494_v13 = vmul.f32 %v3303_v39, %v3543_v24  ;;  %v958_v47 = vld [vmem:[#allocation2 + $0x120] sm:$0xff] }
 0x2dc   : > { %v1226_v56 = vadd.f32 %v1194_v25, %v1125_v40  ;;  %v994_v60 = vmul.f32 %v3256_v28, %v957_v54  ;;  %v1627_v1 = vadd.f32 %v1595_v53, %v1525_v45  ;;  %v1126_v9 = vadd.f32 %v1094_v62, %v1025_v37  ;;  %v1058_v45 = vld [vmem:[#allocation2 + $0x111] sm:$0xff] }
 0x2dd   : > { %v1326_v32 = vadd.f32 %v1294_v14, %v1225_v57  ;;  %v1195_v12 = vmul.f32 %v3277_v48, %v3568_v8  ;;  %v3580_v33 = vadd.f32 %v1795_v51, %v1726_v6  ;;  %v1727_v38 = vadd.f32 %v1695_v59, %v1626_v21  ;;  %v1159_v14 = vld [vmem:[#allocation2 + $0x112] sm:$0xff] }
 0x2de   : > { %v1526_v4 = vadd.f32 %v1494_v13, %v1425_v23  ;;  %v1295_v46 = vmul.f32 %v3284_v52, %v957_v54  ;;  %v1426_v40 = vadd.f32 %v1394_v63, %v1325_v61  ;;  %v1495_v26 = vmul.f32 %v3303_v39, %v1157_v30 }
 0x2df   : > { %4211 = vst [vmem:[#allocation54_spill] sm:$0xff] %v3580_v33  ;;  %v1696_v25 = vmul.f32 %v3330_v7, %v1056_v22  ;;  %v1395_v36 = vmul.f32 %v3296_v3, %v1057_v58  ;;  %v1596_v57 = vmul.f32 %v3317_v42, %v956_v35  ;;  %v1026_v37 = vadd.f32 %v3265_v44, %v994_v60  ;;  %v1059_v60 = vld [vmem:[#allocation2 + $0x121] sm:$0xff] }
 0x2e0   : > { %v1327_v53 = vadd.f32 %v1295_v46, %v1226_v56  ;;  %v995_v51 = vmul.f32 %v3256_v28, %v958_v47  ;;  %v1796_v23 = vmul.f32 %v3341_v11, %v3543_v24  ;;  %v1227_v59 = vadd.f32 %v1195_v12, %v1126_v9  ;;  %v959_v24 = vld [vmem:[#allocation2 + $0x128] sm:$0xff] }
 0x2e1   : > { %v1728_v6 = vadd.f32 %v1696_v25, %v1627_v1  ;;  %v1427_v21 = vadd.f32 %v1395_v36, %v1326_v32  ;;  %v1797_v61 = vmul.f32 %v3341_v11, %v1157_v30  ;;  %v1628_v62 = vadd.f32 %v1596_v57, %v1526_v4 }
 0x2e2   : > { %v1095_v22 = vmul.f32 %v3270_v0, %v1058_v45  ;;  %v1396_v63 = vmul.f32 %v3296_v3, %v1058_v45  ;;  %v1527_v35 = vadd.f32 %v1495_v26, %v1426_v40  ;;  %v3594_v13 = vadd.f32 %v1796_v23, %v1727_v38  ;;  %v1160_v40 = vld [vmem:[#allocation2 + $0x122] sm:$0xff] }
 0x2e3   : > { %v1496_v56 = vmul.f32 %v3303_v39, %v3568_v8  ;;  %v1296_v1 = vmul.f32 %v3284_v52, %v958_v47  ;;  %v1697_v36 = vmul.f32 %v3330_v7, %v1057_v58  ;;  %v1027_v32 = vadd.f32 %v3265_v44, %v995_v51 }
 0x2e4   : > { %4212 = vst [vmem:[#allocation55_spill] sm:$0xff] %v3594_v13  ;;  %v1127_v9 = vadd.f32 %v1095_v22, %v1026_v37  ;;  %v1428_v30 = vadd.f32 %v1396_v63, %v1327_v53  ;;  %v3601_v12 = vadd.f32 %v1797_v61, %v1728_v6  ;;  %v1196_v4 = vmul.f32 %v3277_v48, %v1159_v14 }
 0x2e5   : > { %v1528_v46 = vadd.f32 %v1496_v56, %v1427_v21  ;;  %v1328_v38 = vadd.f32 %v1296_v1, %v1227_v59  ;;  %v1729_v26 = vadd.f32 %v1697_v36, %v1628_v62  ;;  %v1497_v25 = vmul.f32 %v3303_v39, %v1159_v14  ;;  %v1060_v59 = vld [vmem:[#allocation2 + $0x129] sm:$0xff]  ;;  %v960_v1 = vld [vmem:[#allocation2 + $0x138] sm:$0xff] }
 0x2e6   : > { %4213 = vst [vmem:[#allocation56_spill] sm:$0xff] %v3601_v12  ;;  %v1096_v57 = vmul.f32 %v3270_v0, %v1059_v60  ;;  %v996_v23 = vmul.f32 %v3256_v28, %v959_v24  ;;  %v1597_v58 = vmul.f32 %v3317_v42, %v957_v54  ;;  %v1698_v37 = vmul.f32 %v3330_v7, %v1058_v45  ;;  %v1161_v36 = vld [vmem:[#allocation2 + $0x12a] sm:$0xff] }
 0x2e7   : > { %v1397_v53 = vmul.f32 %v3296_v3, %v1059_v60  ;;  %v1598_v51 = vmul.f32 %v3317_v42, %v958_v47  ;;  %v1228_v6 = vadd.f32 %v1196_v4, %v1127_v9  ;;  %v1529_v61 = vadd.f32 %v1497_v25, %v1428_v30 }
 0x2e8   : > { %v1128_v21 = vadd.f32 %v1096_v57, %v1027_v32  ;;  %v1197_v62 = vmul.f32 %v3277_v48, %v1160_v40  ;;  %v1629_v22 = vadd.f32 %v1597_v58, %v1527_v35  ;;  %v1798_v63 = vmul.f32 %v3341_v11, %v3568_v8  ;;  %v1061_v58 = vld [vmem:[#allocation2 + $0x139] sm:$0xff] }
 0x2e9   : > { %v1429_v56 = vadd.f32 %v1397_v53, %v1328_v38  ;;  %v1630_v28 = vadd.f32 %v1598_v51, %v1528_v46  ;;  %v1799_v54 = vmul.f32 %v3341_v11, %v1159_v14  ;;  %v1028_v45 = vadd.f32 %v3265_v44, %v996_v23  ;;  %v2211_v44 = vld [vmem:[%s4124_s1 + $0x4] ss:$0 sm:$0xff] }
 0x2ea   : > { %v1297_v47 = vmul.f32 %v3284_v52, %v959_v24  ;;  %v1599_v9 = vmul.f32 %v3317_v42, %v959_v24  ;;  %v3618_v30 = vadd.f32 %v1798_v63, %v1729_v26  ;;  %v1699_v32 = vmul.f32 %v3330_v7, %v1059_v60  ;;  %v3630_v51 = vld [vmem:[#allocation2 + $0x140] sm:$0xff] }
 0x2eb   : > { %v1097_v35 = vmul.f32 %v3270_v0, %v1060_v59  ;;  %v1498_v8 = vmul.f32 %v3303_v39, %v1160_v40  ;;  %v1229_v4 = vadd.f32 %v1197_v62, %v1128_v21  ;;  %v997_v14 = vmul.f32 %v2211_v44, %v960_v1  ;;  %v3638_v62 = vld [vmem:[#allocation2 + $0x158] sm:$0xff]  ;;  %v2212_v63 = vld [vmem:[%s4124_s1 + $0x2] ss:$0 sm:$0xff] }
 0x2ec   : > { %4214 = vst [vmem:[#allocation57_spill] sm:$0xff] %v3618_v30  ;;  %v1329_v46 = vadd.f32 %v1297_v47, %v1228_v6  ;;  %v1631_v38 = vadd.f32 %v1599_v9, %v1529_v61  ;;  %v1730_v25 = vadd.f32 %v1698_v37, %v1629_v22  ;;  %v1731_v57 = vadd.f32 %v1699_v32, %v1630_v28  ;;  %v3632_v6 = vld [vmem:[#allocation2 + $0x150] sm:$0xff]  ;;  %v3658_v47 = vld [vmem:[#allocation2 + $0x141] sm:$0xff] }
 0x2ed   : > { %v1198_v24 = vmul.f32 %v3277_v48, %v1161_v36  ;;  %v1530_v26 = vadd.f32 %v1498_v8, %v1429_v56  ;;  %v1129_v23 = vadd.f32 %v1097_v35, %v1028_v45  ;;  %v1398_v60 = vmul.f32 %v3296_v3, %v1060_v59  ;;  %v3640_v3 = vld [vmem:[#allocation2 + $0x168] sm:$0xff]  ;;  %v3711_v30 = vld [vmem:[#allocation2 + $0x172] sm:$0xff] }
 0x2ee   : > { %v1700_v0 = vmul.f32 %v3330_v7, %v1060_v59  ;;  %v1298_v53 = vmul.f32 %v3284_v52, %v960_v1  ;;  %v1499_v61 = vmul.f32 %v3303_v39, %v1161_v36  ;;  %v1800_v37 = vmul.f32 %v3341_v11, %v1160_v40  ;;  %v3642_v59 = vld [vmem:[#allocation2 + $0x170] sm:$0xff]  ;;  %v3655_v45 = vld [vmem:[%s4124_s1 + $0x8] ss:$0 sm:$0xff] }
 0x2ef   : > { %v1801_v21 = vmul.f32 %v3341_v11, %v1161_v36  ;;  %v1600_v48 = vmul.f32 %v3317_v42, %v960_v1  ;;  %v1430_v22 = vadd.f32 %v1398_v60, %v1329_v46  ;;  %v1029_v56 = vadd.f32 %v2212_v63, %v997_v14  ;;  %v2213_v11 = vld [vmem:[%s4124_s1 + $0x5] ss:$0 sm:$0xff]  ;;  %v818_v14 = vld [vmem:[%s4125_s2 + $0x2] sm:$0x3] }
 0x2f0   : > { %v1732_v52 = vadd.f32 %v1700_v0, %v1631_v38  ;;  %v1330_v39 = vadd.f32 %v1298_v53, %v1229_v4  ;;  %v1098_v40 = vmul.f32 %v2213_v11, %v1061_v58  ;;  %v998_v28 = vmul.f32 %v2211_v44, %v3630_v51 }
 0x2f1   : > { %v1632_v42 = vadd.f32 %v1600_v48, %v1530_v26  ;;  %v999_v1 = vmul.f32 %v2211_v44, %v3632_v6  ;;  %v1399_v36 = vmul.f32 %v3655_v45, %v1061_v58  ;;  %v1000_v9 = vmul.f32 %v2211_v44, %v3638_v62  ;;  %v3675_v48 = vld [vmem:[#allocation2 + $0x13a] sm:$0xff] }
 0x2f2   : > { %v1001_v32 = vmul.f32 %v2211_v44, %v3640_v3  ;;  %v1002_v35 = vmul.f32 %v2211_v44, %v3642_v59  ;;  %v3663_v8 = vadd.f32 %v1799_v54, %v1730_v25  ;;  %v1230_v4 = vadd.f32 %v1198_v24, %v1129_v23  ;;  %v3677_v44 = vld [vmem:[#allocation2 + $0x142] sm:$0xff]  ;;  %v3679_v54 = vld [vmem:[#allocation2 + $0x151] sm:$0xff]  ;;  %v3684_v23 = vld [vmem:[#allocation2 + $0x159] sm:$0xff] }
 0x2f3   : > { %v3665_v46 = vadd.f32 %v1800_v37, %v1731_v57  ;;  %v1701_v38 = vmul.f32 %v3330_v7, %v1061_v58  ;;  %v3671_v26 = vadd.f32 %v1499_v61, %v1430_v22  ;;  %v3673_v60 = vadd.f32 %v1801_v21, %v1732_v52  ;;  %v3686_v58 = vld [vmem:[#allocation2 + $0x169] sm:$0xff]  ;;  %v3688_v61 = vld [vmem:[#allocation2 + $0x171] sm:$0xff] }
 0x2f4   : > { %4215 = vst [vmem:[#allocation58_spill] sm:$0xff] %v3663_v8  ;;  %v1130_v0 = vadd.f32 %v1098_v40, %v1029_v56  ;;  %v1431_v53 = vadd.f32 %v1399_v36, %v1330_v39  ;;  %v1030_v57 = vadd.f32 %v2212_v63, %v998_v28  ;;  %v1099_v7 = vmul.f32 %v2213_v11, %v3658_v47  ;;  %v3690_v22 = vld [vmem:[#allocation2 + $0x152] sm:$0xff]  ;;  %v2215_v40 = vld [vmem:[%s4124_s1 + $0x6] ss:$0 sm:$0xff] }
 0x2f5   : > { %4216 = vst [vmem:[#allocation59_spill] sm:$0xff] %v3665_v46  ;;  %4217 = vst [vmem:[#allocation60_spill] sm:$0xff] %v3673_v60  ;;  %v3681_v25 = vadd.f32 %v1701_v38, %v1632_v42  ;;  %v1031_v24 = vadd.f32 %v2212_v63, %v999_v1  ;;  %v1032_v21 = vadd.f32 %v2212_v63, %v1000_v9  ;;  %v2216_v1 = vld [vmem:[%s4124_s1 + $0x7] ss:$0 sm:$0xff]  ;;  %v3702_v38 = vld [vmem:[#allocation2 + $0x16a] sm:$0xff] }
 0x2f6   : > { %v1033_v52 = vadd.f32 %v2212_v63, %v1001_v32  ;;  %v1034_v56 = vadd.f32 %v2212_v63, %v1002_v35  ;;  %v1199_v42 = vmul.f32 %v2215_v40, %v3675_v48  ;;  %v1200_v28 = vmul.f32 %v2215_v40, %v3677_v44  ;;  %v3708_v46 = vld [vmem:[#allocation2 + $0x15a] sm:$0xff] }
 0x2f7   : > { %v1299_v36 = vmul.f32 %v2216_v1, %v3630_v51  ;;  %v1100_v9 = vmul.f32 %v2213_v11, %v3679_v54  ;;  %v1101_v63 = vmul.f32 %v2213_v11, %v3684_v23  ;;  %v1102_v32 = vmul.f32 %v2213_v11, %v3686_v58 }
 0x2f8   : > { %v1103_v35 = vmul.f32 %v2213_v11, %v3688_v61  ;;  %v1201_v8 = vmul.f32 %v2215_v40, %v3690_v22  ;;  %v1203_v17 = vmul.f32 %v2215_v40, %v3702_v38  ;;  %v1400_v31 = vmul.f32 %v3655_v45, %v3658_v47  ;;  %v3719_v11 = vld [vmem:[%s4124_s1 + $0x9] ss:$0 sm:$0xff] }
 0x2f9   : > { %v1132_v60 = vadd.f32 %v1100_v9, %v1031_v24  ;;  %v1133_v13 = vadd.f32 %v1101_v63, %v1032_v21  ;;  %v1134_v33 = vadd.f32 %v1102_v32, %v1033_v52  ;;  %v1231_v21 = vadd.f32 %v1199_v42, %v1130_v0  ;;  %v3732_v32 = vld [vmem:[%s4124_s1 + $0xa] ss:$0 sm:$0xff] }
 0x2fa   : > { %v1135_v55 = vadd.f32 %v1103_v35, %v1034_v56  ;;  %v1331_v52 = vadd.f32 %v1299_v36, %v1230_v4  ;;  %v1204_v56 = vmul.f32 %v2215_v40, %v3711_v30  ;;  %v3736_v35 = vmul.f32 %v3732_v32, %v3630_v51 }
 0x2fb   : > { %v1233_v0 = vadd.f32 %v1201_v8, %v1132_v60  ;;  %v1300_v51 = vmul.f32 %v2216_v1, %v3632_v6  ;;  %v1502_v27 = vmul.f32 %v3719_v11, %v3690_v22 }
 0x2fc   : > { %v1432_v2 = vadd.f32 %v1400_v31, %v1331_v52 }
 0x2fd   : > { %v1332_v8 = vadd.f32 %v1300_v51, %v1231_v21  ;;  %v1402_v21 = vmul.f32 %v3655_v45, %v3684_v23  ;;  %v1403_v51 = vmul.f32 %v3655_v45, %v3686_v58 }
 0x308   : > { %v830_v37 = vpop.permute.xlu1 %829 }
 0x309   : > { %v832_v39 = vmul.f32 %v830_v37, %v818_v14  ;;  %v1131_v37 = vadd.f32 %v1099_v7, %v1030_v57  ;;  %v1500_v57 = vmul.f32 %v3719_v11, %v3675_v48  ;;  %v1501_v7 = vmul.f32 %v3719_v11, %v3677_v44 }
 0x30b   : > { %v833_v14 = vsel %vm820_vm1, %v832_v39, 0.0  ;;  %v1202_v39 = vmul.f32 %v2215_v40, %v3708_v46  ;;  %v1232_v9 = vadd.f32 %v1200_v28, %v1131_v37  ;;  %v3727_v63 = vadd.f32 %v1500_v57, %v1431_v53  ;;  %v3745_v53 = vld [vmem:[%s4124_s1 + $0xb] ss:$0 sm:$0xff] }
 0x30c   : > { %v834_v12 = vrot.slane %v833_v14, 4  ;;  %v1235_v40 = vadd.f32 %v1203_v17, %v1134_v33  ;;  %v1236_v28 = vadd.f32 %v1204_v56, %v1135_v55  ;;  %v3749_v36 = vmul.f32 %v3745_v53, %v3658_v47  ;;  %v3760_v33 = vld [vmem:[%s4124_s1 + $0xc] ss:$0 sm:$0xff] }
 0x30d   : > { %v1234_v42 = vadd.f32 %v1202_v39, %v1133_v13  ;;  %v1302_v57 = vmul.f32 %v2216_v1, %v3640_v3  ;;  %v1303_v13 = vmul.f32 %v2216_v1, %v3642_v59  ;;  %v1304_v55 = vmul.f32 %v2216_v1, %v3738_v50  ;;  %v3768_v39 = vld [vmem:[#allocation2 + $0x189] sm:$0xff] }
 0x30e   : > { %v835_v24 = vadd.f32 %v834_v12, %v833_v14  ;;  %v3740_v12 = vld [vmem:[#allocation2 + $0x188] sm:$0xff]  ;;  %v1301_v14 = vmul.f32 %v2216_v1, %v3638_v62  ;;  %v3764_v47 = vmul.f32 %v3760_v33, %v3675_v48  ;;  %v1401_v48 = vmul.f32 %v3655_v45, %v3679_v54 }
 0x30f   : > { %v1305_v17 = vmul.f32 %v2216_v1, %v3740_v12  ;;  %v1335_v20 = vadd.f32 %v1303_v13, %v1234_v42  ;;  %v1336_v41 = vadd.f32 %v1304_v55, %v1235_v40  ;;  %v1406_v40 = vmul.f32 %v3655_v45, %v3768_v39 }
 0x310   : > { %v836_v4 = vrot.slane %v835_v24, 2  ;;  %v1333_v60 = vadd.f32 %v1301_v14, %v1232_v9  ;;  %v3787_v31 = vmul.f32 %v3760_v33, %v3677_v44  ;;  %v1433_v52 = vadd.f32 %v1401_v48, %v1332_v8  ;;  %v1469_v14 = vld [vmem:[#allocation2 + $0x182] sm:$0xff] }
 0x311   : > { %v1337_v1 = vadd.f32 %v1305_v17, %v1236_v28  ;;  %v1533_v43 = vadd.f32 %v1501_v7, %v1432_v2  ;;  %v1504_v44 = vmul.f32 %v3719_v11, %v3702_v38  ;;  %v1505_v8 = vmul.f32 %v3719_v11, %v3711_v30 }
 0x312   : > { %v837_v37 = vadd.f32 %v836_v4, %v835_v24  ;;  %v3766_v24 = vld [vmem:[#allocation2 + $0x181] sm:$0xff]  ;;  %v1334_v4 = vadd.f32 %v1302_v57, %v1233_v0  ;;  %v1404_v0 = vmul.f32 %v3655_v45, %v3688_v61  ;;  %v1434_v28 = vadd.f32 %v1402_v21, %v1333_v60 }
 0x313   : > { %v1405_v42 = vmul.f32 %v3655_v45, %v3766_v24  ;;  %v1503_v45 = vmul.f32 %v3719_v11, %v3708_v46  ;;  %v1602_v2 = vmul.f32 %v3732_v32, %v3632_v6  ;;  %v1844_v60 = vlaneseq }
 0x314   : > { %v838_v56 = vrot.slane %v837_v37, 1  ;;  %v1435_v13 = vadd.f32 %v1403_v51, %v1334_v4  ;;  %v1436_v55 = vadd.f32 %v1404_v0, %v1335_v20  ;;  %v1603_v51 = vmul.f32 %v3732_v32, %v3638_v62 }
 0x315   : > { %v1437_v17 = vadd.f32 %v1405_v42, %v1336_v41  ;;  %v1534_v41 = vadd.f32 %v1502_v27, %v1433_v52  ;;  %v1535_v7 = vadd.f32 %v1503_v45, %v1434_v28  ;;  %v1604_v0 = vmul.f32 %v3732_v32, %v3640_v3 }
 0x316   : > { %v839_v9 = vadd.f32 %v838_v56, %v837_v37  ;;  %v1470_v37 = vld [vmem:[#allocation2 + $0x18a] sm:$0xff]  ;;  %v1438_v56 = vadd.f32 %v1406_v40, %v1337_v1  ;;  %v1536_v4 = vadd.f32 %v1504_v44, %v1435_v13  ;;  %v1537_v1 = vadd.f32 %v1505_v8, %v1436_v55 }
 0x317   : > { %v1507_v20 = vmul.f32 %v3719_v11, %v1470_v37  ;;  %v1634_v27 = vadd.f32 %v1602_v2, %v3727_v63  ;;  %v1703_v6 = vmul.f32 %v3745_v53, %v3679_v54  ;;  %v1606_v42 = vmul.f32 %v3732_v32, %v3738_v50 }
 0x318   : > { %v840_v57 = vadd.f32 %v839_v9, %v251_v5  ;;  %v1506_v5 = vmul.f32 %v3719_v11, %v1469_v14  ;;  %v1633_v9 = vadd.f32 %v3736_v35, %v3671_v26  ;;  %v1605_v11 = vmul.f32 %v3732_v32, %v3642_v59 }
 0x319   : > { %v1539_v21 = vadd.f32 %v1507_v20, %v1438_v56  ;;  %v1607_v26 = vmul.f32 %v3732_v32, %v3740_v12  ;;  %v1635_v35 = vadd.f32 %v1603_v51, %v1533_v43  ;;  %v1636_v40 = vadd.f32 %v1604_v0, %v1534_v41  ;;  %v4219_v41 = vld [vmem:[#allocation10_spill] sm:$0xff]  ;;  %v4224_v0 = vld [vmem:[#allocation15_spill] sm:$0xff] }
 0x31a   : > { %2209 = vtanh.f32 %v840_v57  ;;  %v1538_v48 = vadd.f32 %v1506_v5, %v1437_v17  ;;  %v1637_v62 = vadd.f32 %v1605_v11, %v1535_v7  ;;  %v1845_v52 = vshrl.u32 %v1844_v60, 7  ;;  %v4220_v60 = vld [vmem:[#allocation11_spill] sm:$0xff]  ;;  %v4223_v51 = vld [vmem:[#allocation14_spill] sm:$0xff] }
 0x31b   : > { %v1638_v28 = vadd.f32 %v1606_v42, %v1536_v4  ;;  %v1639_v3 = vadd.f32 %v1607_v26, %v1537_v1  ;;  %v1641_v59 = vadd.f32 %v3480_v10, %v1539_v21  ;;  %v1734_v63 = vadd.f32 %v3749_v36, %v1633_v9  ;;  %v4221_v1 = vld [vmem:[#allocation12_spill] sm:$0xff]  ;;  %v4222_v21 = vld [vmem:[#allocation13_spill] sm:$0xff]  ;;  %v4227_v42 = vld [vmem:[#allocation18_spill] sm:$0xff] }
 0x31c   : > { %v1640_v57 = vadd.f32 %v3473_v18, %v1538_v48  ;;  %v1704_v54 = vmul.f32 %v3745_v53, %v3684_v23  ;;  %v1705_v50 = vmul.f32 %v3745_v53, %v3686_v58  ;;  %v1706_v43 = vmul.f32 %v3745_v53, %v3688_v61  ;;  %v4228_v26 = vld [vmem:[#allocation19_spill] sm:$0xff] }
 0x31d   : > { %v1735_v32 = vadd.f32 %v1703_v6, %v1634_v27  ;;  %v1804_v12 = vmul.f32 %v3760_v33, %v3690_v22  ;;  %v1707_v18 = vmul.f32 %v3745_v53, %v3766_v24  ;;  %v1708_v10 = vmul.f32 %v3745_v53, %v3768_v39  ;;  %v4226_v6 = vld [vmem:[#allocation17_spill] sm:$0xff] }
 0x31e   : > { %v1736_v36 = vadd.f32 %v1704_v54, %v1635_v35  ;;  %v1737_v13 = vadd.f32 %v1705_v50, %v1636_v40  ;;  %v1738_v55 = vadd.f32 %v1706_v43, %v1637_v62  ;;  %v1846_v23 = vsub.s32 0, %v1845_v52  ;;  %v4229_v40 = vld [vmem:[#allocation20_spill] sm:$0xff]  ;;  %v4230_v52 = vld [vmem:[#allocation21_spill] sm:$0xff] }
 0x31f   : > { %v1739_v17 = vadd.f32 %v1707_v18, %v1638_v28  ;;  %v1740_v56 = vadd.f32 %v1708_v10, %v1639_v3  ;;  %v1741_v58 = vadd.f32 %v3498_v34, %v1640_v57  ;;  %v1742_v61 = vadd.f32 %v3526_v29, %v1641_v59  ;;  %v4231_v3 = vld [vmem:[#allocation22_spill] sm:$0xff]  ;;  %v4232_v59 = vld [vmem:[#allocation23_spill] sm:$0xff]  ;;  %v4233_v54 = vld [vmem:[#allocation24_spill] sm:$0xff] }
 0x320   : > { %v3835_v45 = vadd.f32 %v3764_v47, %v3681_v25  ;;  %v1805_v22 = vmul.f32 %v3760_v33, %v3708_v46  ;;  %v1806_v53 = vmul.f32 %v3760_v33, %v3702_v38  ;;  %v1807_v24 = vmul.f32 %v3760_v33, %v3711_v30  ;;  %v4234_v43 = vld [vmem:[#allocation25_spill] sm:$0xff]  ;;  %v4236_v10 = vld [vmem:[#allocation27_spill] sm:$0xff] }
 0x321   : > { %v3844_v44 = vadd.f32 %v3787_v31, %v1734_v63  ;;  %v3846_v34 = vadd.f32 %v1804_v12, %v1735_v32  ;;  %v1808_v29 = vmul.f32 %v3760_v33, %v1469_v14  ;;  %v1809_v25 = vmul.f32 %v3760_v33, %v1470_v37  ;;  %v4218_v37 = vld [vmem:[#allocation9_spill] sm:$0xff]  ;;  %v4235_v12 = vld [vmem:[#allocation26_spill] sm:$0xff] }
 0x322   : > { %v3850_v47 = vadd.f32 %v1805_v22, %v1736_v36  ;;  %v3852_v8 = vadd.f32 %v1806_v53, %v1737_v13  ;;  %v3854_v46 = vadd.f32 %v1807_v24, %v1738_v55  ;;  %v3861_v31 = vadd.f32 %v3529_v49, %v1741_v58  ;;  %v4237_v13 = vld [vmem:[#allocation28_spill] sm:$0xff] }
 0x323   : > { %v3856_v5 = vadd.f32 %v1808_v29, %v1739_v17  ;;  %v3858_v30 = vadd.f32 %v1809_v25, %v1740_v56  ;;  %v3864_v20 = vadd.f32 %v3535_v15, %v1742_v61  ;;  %v4225_v15 = vld [vmem:[#allocation16_spill] sm:$0xff]  ;;  %v4239_v56 = vld [vmem:[#allocation30_spill] sm:$0xff]  ;;  %v4240_v61 = vld [vmem:[#allocation31_spill] sm:$0xff] }
 0x324   : > { %v4241_v53 = vld [vmem:[#allocation32_spill] sm:$0xff]  ;;  %v4243_v25 = vld [vmem:[#allocation34_spill] sm:$0xff] }
 0x327   : > { %v2210_v39 = vpop.eup %2209 }
 0x328   : > { %v1847_v38 = vrot.slane %v2210_v39, %v1846_v23  ;;  %v4238_v23 = vld [vmem:[#allocation29_spill] sm:$0xff] }
 0x329   : > { %v4242_v39 = vld [vmem:[#allocation33_spill] sm:$0xff] }
 0x32a   : > { %v1848_v14 = vmul.f32 %v1847_v38, %v2962_v19  ;;  %v1849_v33 = vmul.f32 %v1847_v38, %v2971_v16  ;;  %v1850_v2 = vmul.f32 %v1847_v38, %v4218_v37  ;;  %v1851_v7 = vmul.f32 %v1847_v38, %v4219_v41  ;;  %v4244_v41 = vld [vmem:[#allocation35_spill] sm:$0xff] }
 0x32b   : > { %v1852_v4 = vmul.f32 %v1847_v38, %v4220_v60  ;;  %v1853_v48 = vmul.f32 %v1847_v38, %v4221_v1  ;;  %v1854_v9 = vmul.f32 %v1847_v38, %v4222_v21  ;;  %v1855_v49 = vmul.f32 %v1847_v38, %v4223_v51  ;;  %v4245_v1 = vld [vmem:[#allocation36_spill] sm:$0xff]  ;;  %v4246_v51 = vld [vmem:[#allocation37_spill] sm:$0xff] }
 0x32c   : > { %v1856_v11 = vmul.f32 %v1847_v38, %v4224_v0  ;;  %v1857_v27 = vmul.f32 %v1847_v38, %v4225_v15  ;;  %v1858_v19 = vmul.f32 %v1847_v38, %v4226_v6  ;;  %v1859_v16 = vmul.f32 %v1847_v38, %v4227_v42  ;;  %v4247_v15 = vld [vmem:[#allocation38_spill] sm:$0xff]  ;;  %v4248_v42 = vld [vmem:[#allocation39_spill] sm:$0xff] }
 0x32d   : > { %v1860_v35 = vmul.f32 %v1847_v38, %v4228_v26  ;;  %v1861_v62 = vmul.f32 %v1847_v38, %v4229_v40  ;;  %v1862_v28 = vmul.f32 %v1847_v38, %v4230_v52  ;;  %v1863_v57 = vmul.f32 %v1847_v38, %v4231_v3  ;;  %v4249_v40 = vld [vmem:[#allocation40_spill] sm:$0xff]  ;;  %v4250_v3 = vld [vmem:[#allocation41_spill] sm:$0xff] }
 0x32e   : > { %v1864_v63 = vmul.f32 %v1847_v38, %v4232_v59  ;;  %v1865_v50 = vmul.f32 %v1847_v38, %v4233_v54  ;;  %v1866_v32 = vmul.f32 %v1847_v38, %v4234_v43  ;;  %v1867_v18 = vmul.f32 %v1847_v38, %v4235_v12  ;;  %v4251_v54 = vld [vmem:[#allocation42_spill] sm:$0xff]  ;;  %v4252_v12 = vld [vmem:[#allocation43_spill] sm:$0xff] }
 0x32f   : > { %v1868_v36 = vmul.f32 %v1847_v38, %v4236_v10  ;;  %v1869_v55 = vmul.f32 %v1847_v38, %v4237_v13  ;;  %v1870_v17 = vmul.f32 %v1847_v38, %v4238_v23  ;;  %v1871_v58 = vmul.f32 %v1847_v38, %v4239_v56  ;;  %v4253_v13 = vld [vmem:[#allocation44_spill] sm:$0xff]  ;;  %v4254_v56 = vld [vmem:[#allocation45_spill] sm:$0xff] }
 0x330   : > { %v1872_v22 = vmul.f32 %v1847_v38, %v4240_v61  ;;  %v1873_v24 = vmul.f32 %v1847_v38, %v4241_v53  ;;  %v1874_v29 = vmul.f32 %v1847_v38, %v4242_v39  ;;  %v1875_v37 = vmul.f32 %v1847_v38, %v4243_v25  ;;  %v4255_v53 = vld [vmem:[#allocation46_spill] sm:$0xff]  ;;  %v4256_v25 = vld [vmem:[#allocation47_spill] sm:$0xff] }
 0x331   : > { %v1876_v60 = vmul.f32 %v1847_v38, %v4244_v41  ;;  %v1877_v21 = vmul.f32 %v1847_v38, %v4245_v1  ;;  %v1878_v0 = vmul.f32 %v1847_v38, %v4246_v51  ;;  %v1879_v6 = vmul.f32 %v1847_v38, %v4247_v15  ;;  %v4257_v1 = vld [vmem:[#allocation48_spill] sm:$0xff]  ;;  %v4258_v51 = vld [vmem:[#allocation49_spill] sm:$0xff]  ;;  %v4259_v15 = vld [vmem:[#allocation50_spill] sm:$0xff] }
 0x332   : > { %v1880_v26 = vmul.f32 %v1848_v14, %v4248_v42  ;;  %v1881_v52 = vmul.f32 %v1849_v33, %v4249_v40  ;;  %v1882_v59 = vmul.f32 %v1850_v2, %v4250_v3  ;;  %v1883_v43 = vmul.f32 %v1851_v7, %v4251_v54  ;;  %v4260_v42 = vld [vmem:[#allocation51_spill] sm:$0xff]  ;;  %v4261_v40 = vld [vmem:[#allocation52_spill] sm:$0xff]  ;;  %v4262_v3 = vld [vmem:[#allocation53_spill] sm:$0xff] }
 0x333   : > { %v1884_v10 = vmul.f32 %v1852_v4, %v4252_v12  ;;  %v1885_v23 = vmul.f32 %v1853_v48, %v4253_v13  ;;  %v1886_v61 = vmul.f32 %v1854_v9, %v4254_v56  ;;  %v1887_v39 = vmul.f32 %v1855_v49, %v4255_v53  ;;  %v4263_v54 = vld [vmem:[#allocation54_spill] sm:$0xff]  ;;  %v4264_v12 = vld [vmem:[#allocation55_spill] sm:$0xff]  ;;  %v4265_v13 = vld [vmem:[#allocation56_spill] sm:$0xff] }
 0x334   : > { %v1888_v41 = vmul.f32 %v1856_v11, %v4256_v25  ;;  %v1889_v38 = vmul.f32 %v1857_v27, %v4257_v1  ;;  %v1890_v14 = vmul.f32 %v1858_v19, %v4258_v51  ;;  %v1891_v33 = vmul.f32 %v1859_v16, %v4259_v15  ;;  %v4266_v11 = vld [vmem:[#allocation57_spill] sm:$0xff]  ;;  %v4267_v27 = vld [vmem:[#allocation58_spill] sm:$0xff]  ;;  %v4268_v16 = vld [vmem:[#allocation59_spill] sm:$0xff] }
 0x335   : > { %v1892_v2 = vmul.f32 %v1860_v35, %v4260_v42  ;;  %v1893_v7 = vmul.f32 %v1861_v62, %v4261_v40  ;;  %v1894_v4 = vmul.f32 %v1862_v28, %v4262_v3  ;;  %v1895_v48 = vmul.f32 %v1863_v57, %v4263_v54  ;;  %v4269_v35 = vld [vmem:[#allocation60_spill] sm:$0xff]  ;;  %v2237_v15 = vld [vmem:[%s2483_s22 + $0x80] sm:$0xff]  ;;  %v2238_v42 = vld [vmem:[%s2483_s22 + $0x88] sm:$0xff] }
 0x336   : > { %v1896_v9 = vmul.f32 %v1864_v63, %v4264_v12  ;;  %v1897_v49 = vmul.f32 %v1865_v50, %v4265_v13  ;;  %v1898_v56 = vmul.f32 %v1866_v32, %v4266_v11  ;;  %v3918_v19 = vmul.f32 %v1867_v18, %v4267_v27  ;;  %v2236_v51 = vld [vmem:[%s2483_s22 + $0x78] sm:$0xff]  ;;  %v2239_v40 = vld [vmem:[%s2483_s22 + $0x90] sm:$0xff]  ;;  %v2241_v54 = vld [vmem:[%s2483_s22 + $0xa0] sm:$0xff] }
 0x337   : > { %v3921_v53 = vmul.f32 %v1868_v36, %v4268_v16  ;;  %v3924_v62 = vmul.f32 %v1869_v55, %v4269_v35  ;;  %v3927_v28 = vmul.f32 %v1870_v17, %v3835_v45  ;;  %v3930_v57 = vmul.f32 %v1871_v58, %v3844_v44  ;;  %v2222_v55 = vld [vmem:[%s2483_s22 + $0x8] sm:$0xff]  ;;  %v2223_v17 = vld [vmem:[%s2483_s22 + $0x10] sm:$0xff]  ;;  %v2224_v58 = vld [vmem:[%s2483_s22 + $0x18] sm:$0xff] }
 0x338   : > { %v3933_v63 = vmul.f32 %v1872_v22, %v3846_v34  ;;  %v3936_v50 = vmul.f32 %v1873_v24, %v3850_v47  ;;  %v3939_v32 = vmul.f32 %v1874_v29, %v3852_v8  ;;  %v3942_v18 = vmul.f32 %v1875_v37, %v3854_v46  ;;  %v2221_v8 = vld [vmem:[%s2483_s22] sm:$0xff]  ;;  %v2226_v24 = vld [vmem:[%s2483_s22 + $0x28] sm:$0xff]  ;;  %v2227_v37 = vld [vmem:[%s2483_s22 + $0x30] sm:$0xff] }
 0x339   : > { %v3945_v45 = vmul.f32 %v1876_v60, %v3856_v5  ;;  %v3948_v44 = vmul.f32 %v1877_v21, %v3858_v30  ;;  %v3951_v34 = vmul.f32 %v1878_v0, %v3861_v31  ;;  %v3954_v47 = vmul.f32 %v1879_v6, %v3864_v20  ;;  %v2225_v22 = vld [vmem:[%s2483_s22 + $0x20] sm:$0xff]  ;;  %v2228_v60 = vld [vmem:[%s2483_s22 + $0x38] sm:$0xff]  ;;  %v2242_v12 = vld [vmem:[%s2483_s22 + $0xa8] sm:$0xff] }
 0x33a   : > { %v1912_v36 = vadd.f32 %v2221_v8, %v1880_v26  ;;  %v1913_v46 = vadd.f32 %v2222_v55, %v1881_v52  ;;  %v1914_v5 = vadd.f32 %v2223_v17, %v1882_v59  ;;  %v1915_v30 = vadd.f32 %v2224_v58, %v1883_v43  ;;  %v2229_v0 = vld [vmem:[%s2483_s22 + $0x40] sm:$0xff]  ;;  %v2230_v26 = vld [vmem:[%s2483_s22 + $0x48] sm:$0xff]  ;;  %v2231_v59 = vld [vmem:[%s2483_s22 + $0x50] sm:$0xff] }
 0x33b   : > { %v1916_v31 = vadd.f32 %v2225_v22, %v1884_v10  ;;  %v1917_v29 = vadd.f32 %v2226_v24, %v1885_v23  ;;  %v1918_v20 = vadd.f32 %v2227_v37, %v1886_v61  ;;  %v1919_v21 = vadd.f32 %v2228_v60, %v1887_v39  ;;  %v2232_v43 = vld [vmem:[%s2483_s22 + $0x58] sm:$0xff]  ;;  %v2233_v10 = vld [vmem:[%s2483_s22 + $0x60] sm:$0xff]  ;;  %v2234_v61 = vld [vmem:[%s2483_s22 + $0x68] sm:$0xff] }
 0x33c   : > { %v1920_v6 = vadd.f32 %v2229_v0, %v1888_v41  ;;  %v1921_v52 = vadd.f32 %v2230_v26, %v1889_v38  ;;  %v1922_v25 = vadd.f32 %v2231_v59, %v1890_v14  ;;  %v1923_v1 = vadd.f32 %v2232_v43, %v1891_v33  ;;  %1944 = vst.msk [vmem:[%s3970_s6] sm:$0xff] %vm252_vm0, %v1912_v36  ;;  %v2235_v41 = vld [vmem:[%s2483_s22 + $0x70] sm:$0xff]  ;;  %v2240_v3 = vld [vmem:[%s2483_s22 + $0x98] sm:$0xff]  ;;  %v2245_v27 = vld [vmem:[%s2483_s22 + $0xc0] sm:$0xff] }
 0x33d   : > { %1945 = vst.msk [vmem:[%s3970_s6 + $0x8] sm:$0xff] %vm252_vm0, %v1913_v46  ;;  %1946 = vst.msk [vmem:[%s3970_s6 + $0x10] sm:$0xff] %vm252_vm0, %v1914_v5  ;;  %v1924_v23 = vadd.f32 %v2233_v10, %v1892_v2  ;;  %v1925_v39 = vadd.f32 %v2234_v61, %v1893_v7  ;;  %v1926_v38 = vadd.f32 %v2235_v41, %v1894_v4  ;;  %v2243_v13 = vld [vmem:[%s2483_s22 + $0xb0] sm:$0xff]  ;;  %v2244_v11 = vld [vmem:[%s2483_s22 + $0xb8] sm:$0xff] }
 0x33e   : > { %1947 = vst.msk [vmem:[%s3970_s6 + $0x18] sm:$0xff] %vm252_vm0, %v1915_v30  ;;  %v1927_v14 = vadd.f32 %v2236_v51, %v1895_v48  ;;  %1948 = vst.msk [vmem:[%s3970_s6 + $0x20] sm:$0xff] %vm252_vm0, %v1916_v31  ;;  %v1928_v33 = vadd.f32 %v2237_v15, %v1896_v9  ;;  %v1929_v2 = vadd.f32 %v2238_v42, %v1897_v49  ;;  %v2246_v16 = vld [vmem:[%s2483_s22 + $0xc8] sm:$0xff]  ;;  %v2247_v35 = vld [vmem:[%s2483_s22 + $0xd0] sm:$0xff] }
 0x33f   : > { %1949 = vst.msk [vmem:[%s3970_s6 + $0x28] sm:$0xff] %vm252_vm0, %v1917_v29  ;;  %1950 = vst.msk [vmem:[%s3970_s6 + $0x30] sm:$0xff] %vm252_vm0, %v1918_v20  ;;  %v1930_v7 = vadd.f32 %v2239_v40, %v1898_v56  ;;  %v1931_v4 = vadd.f32 %v2240_v3, %v3918_v19  ;;  %v1932_v48 = vadd.f32 %v2241_v54, %v3921_v53  ;;  %v2251_v8 = vld [vmem:[%s2483_s22 + $0xf0] sm:$0xff]  ;;  %v2252_v55 = vld [vmem:[%s2483_s22 + $0xf8] sm:$0xff] }
 0x340   : > { %1951 = vst.msk [vmem:[%s3970_s6 + $0x38] sm:$0xff] %vm252_vm0, %v1919_v21  ;;  %1952 = vst.msk [vmem:[%s3970_s6 + $0x40] sm:$0xff] %vm252_vm0, %v1920_v6  ;;  %v1933_v9 = vadd.f32 %v2242_v12, %v3924_v62  ;;  %v1934_v49 = vadd.f32 %v2243_v13, %v3927_v28  ;;  %v1935_v56 = vadd.f32 %v2244_v11, %v3930_v57  ;;  %v2248_v28 = vld [vmem:[%s2483_s22 + $0xd8] sm:$0xff] }
 0x341   : > { %1953 = vst.msk [vmem:[%s3970_s6 + $0x48] sm:$0xff] %vm252_vm0, %v1921_v52  ;;  %1954 = vst.msk [vmem:[%s3970_s6 + $0x50] sm:$0xff] %vm252_vm0, %v1922_v25  ;;  %v1936_v19 = vadd.f32 %v2245_v27, %v3933_v63  ;;  %v1937_v53 = vadd.f32 %v2246_v16, %v3936_v50  ;;  %v1938_v62 = vadd.f32 %v2247_v35, %v3939_v32  ;;  %v2249_v63 = vld [vmem:[%s2483_s22 + $0xe0] sm:$0xff]  ;;  %v2250_v32 = vld [vmem:[%s2483_s22 + $0xe8] sm:$0xff]  ;;  %s2281_s22 = scalar_lea.vmem %s4048_s7, 4096 }
 0x342   : > { %1955 = vst.msk [vmem:[%s3970_s6 + $0x58] sm:$0xff] %vm252_vm0, %v1923_v1  ;;  %1956 = vst.msk [vmem:[%s3970_s6 + $0x60] sm:$0xff] %vm252_vm0, %v1924_v23  ;;  %v1939_v57 = vadd.f32 %v2248_v28, %v3942_v18  ;;  %v1940_v50 = vadd.f32 %v2249_v63, %v3945_v45  ;;  %v1941_v18 = vadd.f32 %v2250_v32, %v3948_v44  ;;  %p2282_p11 = scmp.ne.s32.totalorder %s4048_s7, %s2281_s22  ;;  %p2289_p7 = scmp.lt.s32.totalorder %s2287_s11, %s2281_s22 }
 0x343   : > { %1957 = vst.msk [vmem:[%s3970_s6 + $0x68] sm:$0xff] %vm252_vm0, %v1925_v39  ;;  %1958 = vst.msk [vmem:[%s3970_s6 + $0x70] sm:$0xff] %vm252_vm0, %v1926_v38  ;;  %v1942_v36 = vadd.f32 %v2251_v8, %v3951_v34  ;;  %v1943_v46 = vadd.f32 %v2252_v55, %v3954_v47 }
 0x344   : > { %1959 = vst.msk [vmem:[%s3970_s6 + $0x78] sm:$0xff] %vm252_vm0, %v1927_v14  ;;  %1960 = vst.msk [vmem:[%s3970_s6 + $0x80] sm:$0xff] %vm252_vm0, %v1928_v33  ;;  %p2283_p13 = pnand %p2282_p11, %p4270_p12  ;;  %p2290_p8 = por %p2289_p7, %p2288_p5 }
 0x345   : > { %1961 = vst.msk [vmem:[%s3970_s6 + $0x88] sm:$0xff] %vm252_vm0, %v1929_v2  ;;  %1962 = vst.msk [vmem:[%s3970_s6 + $0x90] sm:$0xff] %vm252_vm0, %v1930_v7 }
 0x346   : > { %1963 = vst.msk [vmem:[%s3970_s6 + $0x98] sm:$0xff] %vm252_vm0, %v1931_v4  ;;  %1964 = vst.msk [vmem:[%s3970_s6 + $0xa0] sm:$0xff] %vm252_vm0, %v1932_v48  ;;  %p2284_p4 = pneg %p2283_p13 }
 0x347   : > { %1965 = vst.msk [vmem:[%s3970_s6 + $0xa8] sm:$0xff] %vm252_vm0, %v1933_v9  ;;  %1966 = vst.msk [vmem:[%s3970_s6 + $0xb0] sm:$0xff] %vm252_vm0, %v1934_v49 }
 0x348   : > { %1967 = vst.msk [vmem:[%s3970_s6 + $0xb8] sm:$0xff] %vm252_vm0, %v1935_v56  ;;  %1968 = vst.msk [vmem:[%s3970_s6 + $0xc0] sm:$0xff] %vm252_vm0, %v1936_v19  ;;  %p2291_p10 = pnand %p2290_p8, %p2284_p4 }
 0x349   : > { %1969 = vst.msk [vmem:[%s3970_s6 + $0xc8] sm:$0xff] %vm252_vm0, %v1937_v53  ;;  %1970 = vst.msk [vmem:[%s3970_s6 + $0xd0] sm:$0xff] %vm252_vm0, %v1938_v62 }
 0x34a   : > { %1971 = vst.msk [vmem:[%s3970_s6 + $0xd8] sm:$0xff] %vm252_vm0, %v1939_v57  ;;  %1972 = vst.msk [vmem:[%s3970_s6 + $0xe0] sm:$0xff] %vm252_vm0, %v1940_v50 }
 0x34b   : > { %1973 = vst.msk [vmem:[%s3970_s6 + $0xe8] sm:$0xff] %vm252_vm0, %v1941_v18  ;;  %1974 = vst.msk [vmem:[%s3970_s6 + $0xf0] sm:$0xff] %vm252_vm0, %v1942_v36 }
 0x34c   : > { %1975 = vst.msk [vmem:[%s3970_s6 + $0xf8] sm:$0xff] %vm252_vm0, %v1943_v46 }
 0x34d   : > { %2294 = shalt.err (!%p2291_p10)
}
 0x34e   : > { %s2295_s12 = scalar_lea.hbm %s4044_s26, 4096  ;;  %s2299_s29 = scalar_lea.hbm %s4127_s4, 8192 }
 0x34f   : > { %p2296_p0 = scmp.ne.s32.totalorder %s4044_s26, %s2295_s12  ;;  %p2300_p1 = scmp.lt.s32.totalorder %s4044_s26, %s4127_s4 }
 0x350   : > { %p2301_p3 = scmp.lt.s32.totalorder %s2299_s29, %s2295_s12 }
 0x351   : > { %p2297_p2 = pnand %p2296_p0, %p4270_p12 }
 0x352   : > { %p2302_p6 = por %p2301_p3, %p2300_p1 }
 0x353   : > { %p2298_p9 = pneg %p2297_p2 }
 0x355   : > { %p2303_p11 = pnand %p2302_p6, %p2298_p9 }
 0x357   : > { %2306 = shalt.err (!%p2303_p11)
}
 0x358   : > { %s2353_s6 = smov 128   ;;  %s2354_s14 = smov 8  }
 0x359   : > { %2093 = dma.vmem_to_hbm [thread:$0]  (%p4270_p12), %s4048_s7, 4096, %s4044_s26, %s1977_s19, %s2353_s6, %s2353_s6, %s2354_s14  }
 0x35a PF: > { %s2005_s9 = sand.u32 1, %s2333_s15   ;;  %p4271_p13 = scmp.ne.s32.totalorder %s4163_s28, 0 }
 0x35b   : > { %p4272_p4 = scmp.ge.s32.totalorder %s2345_s18, 2  ;;  %s2006_s20 = scalar_lea.sflag [#allocation5], %s2005_s9 }
 0x35d   : > { %p2100_p5 = pnand %p4272_p4, %p4271_p13 }
 0x35f   : > { %p2101_p7 = pneg %p2100_p5 }
 0x361   : > { %2328 = dma.done.wait (%p2101_p7), %s2006_s20, 4096  }
 0x362   : > { %2330 = vsyncadd (%p2101_p7), %s2006_s20, 4294963200  ;;  %p17_p8 = scmp.ge.s32.totalorder %s2405_s21, 4   ;;  %s4273_s15 = smov %s2337_s16 }
 0x363   : > { %s4274_s16 = smov %s2341_s17  ;;  %s4275_s17 = smov %s2417_s24 }
 0x364   : > { %s4276_s18 = smov %s2405_s21  ;;  %19 = sbr.rel (!%p17_p8) target bundleno = 5 (0x5), region = 83 }
 0x369   :  { %2011 = vsyncpa [#allocation4], 1 }
 0x36a   :  { %2013 = vsyncpa [#allocation4 + $0x1], 1 }
 0x36b   :  { %2014 = vsyncpa [#allocation5], 1 }
 0x36c   :  { %2016 = vsyncpa [#allocation5 + $0x1], 1 }

</bundles_post_ra>
